<compile_context>
chip_gen: v5e
topology: v5e:2x2
jax: 0.10.0
libtpu: 0.0.40
codegen_flags: <defaults>
</compile_context>

<pallas_src>
import jax
import jax.numpy as jnp
from jax.experimental import pallas as pl
from jax.experimental.pallas import tpu as pltpu

HIDDEN = 768          # backbone hidden size implied by fc = Linear(769, 1)
FTS_DIM = 1           # 769 - 768
VOCAB = 128           # synthetic vocab == one lane group
LANES = 128           # lane-dense output / sideband width


def _round_up(x, m):
    return ((x + m - 1) // m) * m


# ----------------------------- fused Pallas kernel -----------------------------

def fused_kernel(row_ref, emb_ref, w1_ref, b1_ref, fcw_ref, o_ref):
    # row:  (tm, 128) f32   per-row sideband: lane0 = token id, lane1 = mask, lane2 = fts-head term
    # emb:  (128, 768) bf16 resident embedding table
    # w1:   (768, 768) bf16 resident backbone dense weight
    # b1:   (1, 768)   f32  backbone bias
    # fcw:  (1, 768)   f32  hidden part of the Linear(769,1) weight
    # o:    (tm, 128)  f32  lane-dense output; real result lives in lane 0
    row = row_ref[...]
    tm = row.shape[0]
    ids = row[:, 0:1].astype(jnp.int32)     # (tm, 1)  token ids < 128 -> exact
    msk = row[:, 1:2]                       # (tm, 1)  attention mask (0/1)
    extra = row[:, 2:3]                     # (tm, 1)  fts * fc_w[768] + fc_b

    # In-kernel embedding gather: masked one-hot(ids) @ emb on the MXU (exact selection).
    lanes = jax.lax.broadcasted_iota(jnp.int32, (tm, VOCAB), 1)
    onehot = jnp.where(ids == lanes, msk, 0.0).astype(jnp.bfloat16)          # (tm, 128)
    x = jnp.dot(onehot, emb_ref[...], preferred_element_type=jnp.float32)    # (tm, 768) == bf16 vals
    x = x.astype(jnp.bfloat16)                                               # exact recast

    # Backbone dense + tanh: bf16 MXU with f32 accumulate, f32 epilogue (v5e-safe).
    h = jnp.dot(x, w1_ref[...], preferred_element_type=jnp.float32)
    h = jnp.tanh(h + b1_ref[...])

    # Fused Linear(769,1) head: VPU multiply + lane reduction; fts part arrives via the sideband.
    y = jnp.sum(h * fcw_ref[...], axis=-1, keepdims=True) + extra
    o_ref[...] = jnp.broadcast_to(y, o_ref.shape)


# ----------------------------- wrapper -----------------------------

def _pick_tiling(batch):
    """Generation-aware row tiling (multiples of 16 sublanes)."""
    try:
        kind = jax.devices()[0].device_kind.lower()
    except Exception:
        kind = ""
    dual_tc = "7" in kind                 # v7x: 2 TensorCores per chip
    cap = 256 if dual_tc else 512         # v5e/v6e single TC: bigger tiles amortize per-step overhead
    b16 = _round_up(max(batch, 1), 16)
    if dual_tc and batch >= 32:
        tm = min(cap, _round_up(-(-b16 // 2), 16))   # guarantee >= 2 tiles so both TCs get work
    else:
        tm = min(cap, b16)
    bp = _round_up(batch, tm)
    return tm, bp


def notebook_arranger_forward(kparams, ids, mask, fts):
    """Mirrors NotebookArranger.forward(ids, mask, fts) with the synthetic token-wise encoder."""
    B = ids.shape[0]
    tm, BP = _pick_tiling(B)

    # O(B)-sized glue only — no (B, 768) activations are ever materialized outside the kernel.
    cls_ids = ids[:, 0].astype(jnp.float32)
    cls_mask = mask[:, 0].astype(jnp.float32)
    extra = fts.astype(jnp.float32) @ kparams["fcw_fts"] + kparams["fc_b"]    # (B, 1)

    packed = jnp.stack([cls_ids, cls_mask, extra[:, 0]], axis=1)              # (B, 3)
    rowdata = jnp.zeros((BP, LANES), jnp.float32).at[:B, :3].set(packed)      # lane-dense sideband

    y_pad = pl.pallas_call(
        fused_kernel,
        out_shape=jax.ShapeDtypeStruct((BP, LANES), jnp.float32),
        grid_spec=pltpu.PrefetchScalarGridSpec(
            num_scalar_prefetch=0,
            grid=(BP // tm,),
            in_specs=[
                pl.BlockSpec((tm, LANES), lambda i: (i, 0)),        # per-row sideband (streamed)
                pl.BlockSpec((VOCAB, HIDDEN), lambda i: (0, 0)),    # emb table (resident, 192 KiB)
                pl.BlockSpec((HIDDEN, HIDDEN), lambda i: (0, 0)),   # w1 (resident, 1.125 MiB)
                pl.BlockSpec((1, HIDDEN), lambda i: (0, 0)),        # b1
                pl.BlockSpec((1, HIDDEN), lambda i: (0, 0)),        # fc_w hidden row
            ],
            out_specs=pl.BlockSpec((tm, LANES), lambda i: (i, 0)),
        ),
        compiler_params=pltpu.CompilerParams(
            dimension_semantics=("parallel",),      # row tiles shard across v7x's 2 TCs
            vmem_limit_bytes=32 * 1024 * 1024,      # safe on v5e default scoped / v7x 64 MiB VMEM
        ),
    )(rowdata, kparams["emb_bf"], kparams["w1_bf"], kparams["b1"], kparams["fcw_hidden"])

    return y_pad[:B, :1]                                                      # (B, 1)


def init_params(key):
    k_emb, k_w1, k_fw = jax.random.split(key, 3)
    return {
        "emb": jax.random.normal(k_emb, (VOCAB, HIDDEN), jnp.float32) * 0.02,
        "w1": jax.random.normal(k_w1, (HIDDEN, HIDDEN), jnp.float32) * 0.02,
        "b1": jnp.zeros((1, HIDDEN), jnp.float32),
        "fc_w": jax.random.normal(k_fw, (HIDDEN + FTS_DIM, 1), jnp.float32) * 0.02,
        "fc_b": jnp.zeros((1,), jnp.float32),
    }


def prepare_params(params):
    """One-time conversion into kernel-ready operands (no per-call weight casts / transposes)."""
    return {
        "emb_bf": params["emb"].astype(jnp.bfloat16),                 # (128, 768) bf16
        "w1_bf": params["w1"].astype(jnp.bfloat16),                   # (768, 768) bf16
        "b1": params["b1"],                                           # (1, 768)  f32
        "fcw_hidden": params["fc_w"][:HIDDEN].T.astype(jnp.float32),  # (1, 768)  f32
        "fcw_fts": params["fc_w"][HIDDEN:],                           # (1, 1)    f32
        "fc_b": params["fc_b"],                                       # (1,)      f32
    }


if __name__ == "__main__":
    key = jax.random.PRNGKey(0)
    k_ids, k_mask, k_fts = jax.random.split(key, 3)

    B, S = 2, 8
    ids = jax.random.randint(k_ids, (B, S), 0, VOCAB, dtype=jnp.int32)
    mask = (jax.random.uniform(k_mask, (B, S)) > 0.2).astype(jnp.int32)
    mask = mask.at[:, 0].set(1)                       # CLS always attended
    fts = jax.random.normal(k_fts, (B, FTS_DIM), jnp.float32)

    params = init_params(jax.random.PRNGKey(42))
    kparams = prepare_params(params)

    y = notebook_arranger_forward(kparams, ids, mask, fts)
    y = jax.block_until_ready(y)
    assert y.shape == (B, 1) and y.dtype == jnp.float32

    # Pure-JAX reference of the same module math: full encoder on all tokens, take CLS.
    # (The synthetic encoder is token-wise, so CLS-only kernel evaluation is equivalent.)
    x_emb = params["emb"][ids] * mask[..., None].astype(jnp.float32)
    x_bf = x_emb.reshape(B * S, HIDDEN).astype(jnp.bfloat16).astype(jnp.float32)
    w_bf = params["w1"].astype(jnp.bfloat16).astype(jnp.float32)
    hid = jnp.tanh(x_bf @ w_bf + params["b1"])
    cls = hid.reshape(B, S, HIDDEN)[:, 0, :]
    y_ref = jnp.concatenate([cls, fts], 1) @ params["fc_w"] + params["fc_b"]
    assert jnp.allclose(y, y_ref, atol=1e-2, rtol=1e-2)

    print("KERNEL_OK")
</pallas_src>

<mosaic_0001>
module attributes {stable_mosaic.version = 11 : i64} {
  func.func @fused_kernel(%arg0: i32, %arg1: memref<16x128xf32, #tpu.memory_space<vmem>>, %arg2: memref<128x768xbf16, #tpu.memory_space<vmem>>, %arg3: memref<768x768xbf16, #tpu.memory_space<vmem>>, %arg4: memref<1x768xf32, #tpu.memory_space<vmem>>, %arg5: memref<1x768xf32, #tpu.memory_space<vmem>>, %arg6: memref<16x128xf32, #tpu.memory_space<vmem>>) attributes {dimension_semantics = [#tpu.dimension_semantics<parallel>], iteration_bounds = array<i64: 1>, scalar_prefetch = 0 : i64, scratch_operands = 0 : i64, tpu.core_type = #tpu.core_type<tc>, window_params = [{transform_indices = @transform_0, window_bounds = array<i64: 16, 128>}, {pipeline_mode = #tpu.pipeline_mode<synchronous>, transform_indices = @transform_1, window_bounds = array<i64: 128, 768>}, {pipeline_mode = #tpu.pipeline_mode<synchronous>, transform_indices = @transform_2, window_bounds = array<i64: 768, 768>}, {pipeline_mode = #tpu.pipeline_mode<synchronous>, transform_indices = @transform_3, window_bounds = array<i64: 1, 768>}, {pipeline_mode = #tpu.pipeline_mode<synchronous>, transform_indices = @transform_4, window_bounds = array<i64: 1, 768>}, {transform_indices = @transform_5, window_bounds = array<i64: 16, 128>}]} {
    %c0 = arith.constant 0 : index
    %c0_0 = arith.constant 0 : index
    %0 = vector.load %arg1[%c0, %c0_0] : memref<16x128xf32, #tpu.memory_space<vmem>>, vector<16x128xf32>
    %1 = vector.extract_strided_slice %0 {offsets = [0, 0], sizes = [16, 1], strides = [1, 1]} : vector<16x128xf32> to vector<16x1xf32>
    %2 = arith.fptosi %1 : vector<16x1xf32> to vector<16x1xi32>
    %3 = vector.extract_strided_slice %0 {offsets = [0, 1], sizes = [16, 1], strides = [1, 1]} : vector<16x128xf32> to vector<16x1xf32>
    %4 = vector.extract_strided_slice %0 {offsets = [0, 2], sizes = [16, 1], strides = [1, 1]} : vector<16x128xf32> to vector<16x1xf32>
    %5 = tpu.iota {dimensions = array<i32: 1>} : vector<16x128xi32>
    %6 = vector.broadcast %2 : vector<16x1xi32> to vector<16x128xi32>
    %7 = arith.cmpi eq, %6, %5 : vector<16x128xi32>
    %cst = arith.constant 0.000000e+00 : f32
    %8 = vector.shape_cast %3 : vector<16x1xf32> to vector<16x1xf32>
    %9 = vector.broadcast %8 : vector<16x1xf32> to vector<16x128xf32>
    %10 = vector.broadcast %cst : f32 to vector<16x128xf32>
    %11 = arith.select %7, %9, %10 : vector<16x128xi1>, vector<16x128xf32>
    %12 = arith.truncf %11 : vector<16x128xf32> to vector<16x128xbf16>
    %c0_1 = arith.constant 0 : index
    %c0_2 = arith.constant 0 : index
    %13 = vector.load %arg2[%c0_1, %c0_2] : memref<128x768xbf16, #tpu.memory_space<vmem>>, vector<128x768xbf16>
    %cst_3 = arith.constant dense<0.000000e+00> : vector<16x768xf32>
    %14 = tpu.matmul %12, %13, %cst_3 {dimension_numbers = #tpu.dot_dimension_numbers<[1], [0], [0], [1], [0, 0, 1, 1], [], []>} : vector<16x128xbf16>, vector<128x768xbf16>, vector<16x768xf32> -> vector<16x768xf32>
    %15 = arith.truncf %14 : vector<16x768xf32> to vector<16x768xbf16>
    %c0_4 = arith.constant 0 : index
    %c0_5 = arith.constant 0 : index
    %16 = vector.load %arg3[%c0_4, %c0_5] : memref<768x768xbf16, #tpu.memory_space<vmem>>, vector<768x768xbf16>
    %cst_6 = arith.constant dense<0.000000e+00> : vector<16x768xf32>
    %17 = tpu.matmul %15, %16, %cst_6 {dimension_numbers = #tpu.dot_dimension_numbers<[1], [0], [0], [1], [0, 0, 1, 1], [], []>} : vector<16x768xbf16>, vector<768x768xbf16>, vector<16x768xf32> -> vector<16x768xf32>
    %c0_7 = arith.constant 0 : index
    %c0_8 = arith.constant 0 : index
    %18 = vector.load %arg4[%c0_7, %c0_8] : memref<1x768xf32, #tpu.memory_space<vmem>>, vector<1x768xf32>
    %19 = vector.broadcast %18 : vector<1x768xf32> to vector<16x768xf32>
    %20 = arith.addf %17, %19 : vector<16x768xf32>
    %21 = math.tanh %20 : vector<16x768xf32>
    %c0_9 = arith.constant 0 : index
    %c0_10 = arith.constant 0 : index
    %22 = vector.load %arg5[%c0_9, %c0_10] : memref<1x768xf32, #tpu.memory_space<vmem>>, vector<1x768xf32>
    %23 = vector.broadcast %22 : vector<1x768xf32> to vector<16x768xf32>
    %24 = arith.mulf %21, %23 : vector<16x768xf32>
    %cst_11 = arith.constant dense<0.000000e+00> : vector<16xf32>
    %25 = vector.multi_reduction <add>, %24, %cst_11 [1] : vector<16x768xf32> to vector<16xf32>
    %26 = vector.shape_cast %25 : vector<16xf32> to vector<16x1xf32>
    %27 = arith.addf %26, %4 : vector<16x1xf32>
    %28 = vector.shape_cast %27 : vector<16x1xf32> to vector<16x1xf32>
    %29 = vector.broadcast %28 : vector<16x1xf32> to vector<16x128xf32>
    %c0_12 = arith.constant 0 : index
    %c0_13 = arith.constant 0 : index
    %30 = vector.load %arg6[%c0_12, %c0_13] : memref<16x128xf32, #tpu.memory_space<vmem>>, vector<16x128xf32>
    tpu.vector_store %arg6[%c0_12, %c0_13], %29 {strides = array<i32>} : memref<16x128xf32, #tpu.memory_space<vmem>>, vector<16x128xf32>,
    return
  }
  func.func @transform_0(%arg0: i32) -> (i32, i32) {
    %c0_i32 = arith.constant 0 : i32
    %c0_i32_0 = arith.constant 0 : i32
    return %arg0, %c0_i32 : i32, i32
  }
  func.func @transform_1(%arg0: i32) -> (i32, i32) {
    %c0_i32 = arith.constant 0 : i32
    %c0_i32_0 = arith.constant 0 : i32
    %c0_i32_1 = arith.constant 0 : i32
    return %c0_i32, %c0_i32_0 : i32, i32
  }
  func.func @transform_2(%arg0: i32) -> (i32, i32) {
    %c0_i32 = arith.constant 0 : i32
    %c0_i32_0 = arith.constant 0 : i32
    %c0_i32_1 = arith.constant 0 : i32
    return %c0_i32, %c0_i32_0 : i32, i32
  }
  func.func @transform_3(%arg0: i32) -> (i32, i32) {
    %c0_i32 = arith.constant 0 : i32
    %c0_i32_0 = arith.constant 0 : i32
    %c0_i32_1 = arith.constant 0 : i32
    return %c0_i32, %c0_i32_0 : i32, i32
  }
  func.func @transform_4(%arg0: i32) -> (i32, i32) {
    %c0_i32 = arith.constant 0 : i32
    %c0_i32_0 = arith.constant 0 : i32
    %c0_i32_1 = arith.constant 0 : i32
    return %c0_i32, %c0_i32_0 : i32, i32
  }
  func.func @transform_5(%arg0: i32) -> (i32, i32) {
    %c0_i32 = arith.constant 0 : i32
    %c0_i32_0 = arith.constant 0 : i32
    return %arg0, %c0_i32 : i32, i32
  }
}

</mosaic_0001>

<bundles_post_ra>
// kernel: tpu_custom_call.1
= control target key start
LH: loop header
LB: loop body
LE: loop exit
PB: predicated region body
PF: predicated region fallthrough
CT: control target
= control target key end

     0   :  { %10 = vsyncpa [#allocation3], 0  ;;  %s4938_s0 = inlined_call_operand.hbm [shape: f32[16,128], index: 0, kind: input, shape index: {}]   ;;  %s4939_s1 = inlined_call_operand.hbm [shape: bf16[128,768], index: 1, kind: input, shape index: {}]   ;;  %s4940_s2 = inlined_call_operand.hbm [shape: bf16[768,768], index: 2, kind: input, shape index: {}]   ;;  %s4941_s3 = inlined_call_operand.hbm [shape: f32[1,768], index: 3, kind: input, shape index: {}]   ;;  %s4942_s4 = inlined_call_operand.hbm [shape: f32[1,768], index: 4, kind: input, shape index: {}]   ;;  %s4943_s5 = inlined_call_operand.hbm [shape: f32[16,128], index: 5, kind: output, shape index: {}]  }
   0x1   :  { %11 = vsyncpa [#allocation6], 0 }
   0x2   :  { %12 = vsyncpa [#allocation9], 0  ;;  %s31_s20 = sshll.u32 %s4939_s1, 4  ;;  %s32_s20 = int_to_ptr.hbm [resolvable:$true] %s31_s20 }
   0x3   :  { %13 = vsyncpa [#allocation4], 0  ;;  %s4741_s21 = smov [#allocation5]   ;;  %s58_s25 = sshll.u32 %s4941_s3, 4  ;;  %s59_s25 = int_to_ptr.hbm [resolvable:$true] %s58_s25 }
   0x4   :  { %s33_s22 = sshll.u32 %s4741_s21, 4  ;;  %s4742_s26 = smov 384   ;;  %s34_s22 = int_to_ptr.vmem [resolvable:$true] %s33_s22 }
   0x5   :  { %s4743_s27 = smov 24   ;;  %s4744_s28 = smov [#allocation8]  }
   0x6   :  { %39 = dma.hbm_to_vmem [thread:$0]  %s32_s20, 6144, %s34_s22, [#allocation6], %s4742_s26, %s4742_s26, %s4743_s27  }
   0x7   :  { %s60_s29 = sshll.u32 %s4744_s28, 4  ;;  %s18_s7 = sshll.u32 %s4938_s0, 4  ;;  %s61_s29 = int_to_ptr.vmem [resolvable:$true] %s60_s29  ;;  %s19_s7 = int_to_ptr.hbm [resolvable:$true] %s18_s7 }
   0x8   :  { %63 = dma.hbm_to_vmem [thread:$0]  %s59_s25, 96, %s61_s29, [#allocation9]  }
   0x9   :  { %s4745_s1 = smov [#allocation2]   ;;  %s44_s3 = sshll.u32 %s4940_s2, 4  ;;  %s45_s3 = int_to_ptr.hbm [resolvable:$true] %s44_s3 }
   0xa   :  { %s20_s8 = sshll.u32 %s4745_s1, 4  ;;  %s4746_s11 = smov 128   ;;  %s21_s8 = int_to_ptr.vmem [resolvable:$true] %s20_s8 }
   0xb   :  { %s4747_s12 = smov 8   ;;  %s4748_s13 = smov [#allocation7]  }
   0xc   :  { %26 = dma.hbm_to_vmem [thread:$0]  %s19_s7, 256, %s21_s8, [#allocation3], %s4746_s11, %s4746_s11, %s4747_s12  }
   0xd   :  { %s46_s14 = sshll.u32 %s4748_s13, 4  ;;  %s69_s16 = sshll.u32 %s4942_s4, 4  ;;  %s47_s14 = int_to_ptr.vmem [resolvable:$true] %s46_s14  ;;  %s70_s16 = int_to_ptr.hbm [resolvable:$true] %s69_s16 }
   0xe   :  { %52 = dma.hbm_to_vmem [thread:$0]  %s45_s3, 36864, %s47_s14, [#allocation6], %s4742_s26, %s4742_s26, %s4743_s27  }
   0xf   :  { %s4749_s17 = smov [#allocation10]  }
  0x10   :  { %s71_s18 = sshll.u32 %s4749_s17, 4  ;;  %s72_s18 = int_to_ptr.vmem [resolvable:$true] %s71_s18 }
  0x11   :  { %74 = dma.hbm_to_vmem [thread:$0]  %s70_s16, 96, %s72_s18, [#allocation9]  }
  0x12   :  { %4733 = dma.done.wait [#allocation3], 256  }
  0x13   :  { %4734 = vsyncadd [#allocation3], 4294967040 }
  0x14   :  { %4735 = dma.done.wait [#allocation6], 43008  }
  0x15   :  { %4736 = vsyncadd [#allocation6], 4294924288 }
  0x16   :  { %4737 = dma.done.wait [#allocation9], 192  }
  0x17   :  { %4738 = vsyncadd [#allocation9], 4294967104  ;;  %v4750_v0 = vmov 0   ;;  %v4751_v1 = vmov 1   ;;  %v95_v2 = vld [vmem:[#allocation2] sm:$0xff]  ;;  %v96_v3 = vld [vmem:[#allocation2 + $0x8] sm:$0xff] }
  0x18   :  { %4554 = vset.pattern.permute.xlu0 %v4750_v0  ;;  %4555 = vset.pattern.permute.xlu1 %v4751_v1  ;;  %v3003_v4 = vld [vmem:[#allocation5 + $0x150] sm:$0xf]  ;;  %vm4531_vm0 = vcmp.lt.s32.totalorder %v95_v2, 0  ;;  %v4532_v5 = vceil.f32 %v95_v2  ;;  %v4533_v6 = vfloor.f32 %v95_v2  ;;  %v4556_v7 = vpack.i.bf16 %v96_v3, %v95_v2  ;;  %v4240_v8 = vld [vmem:[#allocation5 + $0x164] sm:$0xf0]  ;;  %s4753_s2 = smov [#allocation11]  }
  0x19   :  { %v4237_v9 = vld [vmem:[#allocation5 + $0x154] sm:$0xf]  ;;  %v3004_v10 = vor.u32 %v4240_v8, %v3003_v4  ;;  %v3005_v11 = vld [vmem:[#allocation5 + $0x168] sm:$0xf0]  ;;  %v2979_v12 = vld [vmem:[#allocation5 + $0x120] sm:$0xf]  ;;  %v4537_v14 = vceil.f32 %v96_v3  ;;  %v4538_v15 = vfloor.f32 %v96_v3 }
  0x1a   :  { %v4534_v13 = vsel %vm4531_vm0, %v4532_v5, %v4533_v6  ;;  %4557 = vperm.xlu1 %4555, %v4556_v7   ;;  %v3008_v16 = vor.u32 %v4237_v9, %v3005_v11  ;;  %v4234_v17 = vld [vmem:[#allocation5 + $0x134] sm:$0xf0]  ;;  %v4231_v18 = vld [vmem:[#allocation5 + $0x124] sm:$0xf]  ;;  %v2981_v19 = vld [vmem:[#allocation5 + $0x138] sm:$0xf0] }
  0x1b   :  { %v4535_v20 = vcvt.f32.s32 %v4534_v13  ;;  %vm4536_vm1 = vcmp.lt.s32.totalorder %v96_v3, 0  ;;  %410 = vmatpush.bf16.msra.mxu0 %v3004_v10  ;;  %v2980_v21 = vor.u32 %v4234_v17, %v2979_v12  ;;  %v2984_v22 = vor.u32 %v4231_v18, %v2981_v19  ;;  %v2955_v23 = vld [vmem:[#allocation5 + $0xf0] sm:$0xf]  ;;  %v4228_v24 = vld [vmem:[#allocation5 + $0x104] sm:$0xf0]  ;;  %s2816_s4 = sshll.u32 %s4753_s2, 4  ;;  %s2817_s4 = int_to_ptr.vmem [resolvable:$true] %s2816_s4 }
  0x1c   :  { %424 = vmatpush.bf16.msra.mxu1 %v3008_v16  ;;  %v4225_v25 = vld [vmem:[#allocation5 + $0xf4] sm:$0xf]  ;;  %v2957_v26 = vld [vmem:[#allocation5 + $0x108] sm:$0xf0]  ;;  %v3011_v27 = vld [vmem:[#allocation5 + $0x158] sm:$0xf]  ;;  %v4539_v28 = vsel %vm4536_vm1, %v4537_v14, %v4538_v15  ;;  %v2956_v32 = vor.u32 %v4228_v24, %v2955_v23 }
  0x1d   :  { %102 = vperm.xlu0 %4554, %v4535_v20   ;;  %v4241_v29 = vld [vmem:[#allocation5 + $0x16c] sm:$0xf0]  ;;  %v4238_v30 = vld [vmem:[#allocation5 + $0x15c] sm:$0xf]  ;;  %v3013_v31 = vld [vmem:[#allocation5 + $0x170] sm:$0xf0]  ;;  %v2960_v37 = vor.u32 %v4225_v25, %v2957_v26  ;;  %v4540_v41 = vcvt.f32.s32 %v4539_v28 }
  0x1e   :  { %v2931_v33 = vld [vmem:[#allocation5 + $0xc0] sm:$0xf]  ;;  %v4222_v34 = vld [vmem:[#allocation5 + $0xd4] sm:$0xf0]  ;;  %v3012_v35 = vor.u32 %v4241_v29, %v3011_v27  ;;  %v3016_v36 = vor.u32 %v4238_v30, %v3013_v31  ;;  %v4219_v38 = vld [vmem:[#allocation5 + $0xc4] sm:$0xf] }
  0x1f   :  { %411 = vmatpush.bf16.msra.mxu0 %v2980_v21  ;;  %v2987_v39 = vld [vmem:[#allocation5 + $0x128] sm:$0xf]  ;;  %v4235_v40 = vld [vmem:[#allocation5 + $0x13c] sm:$0xf0]  ;;  %v2933_v42 = vld [vmem:[#allocation5 + $0xd8] sm:$0xf0]  ;;  %v2932_v47 = vor.u32 %v4222_v34, %v2931_v33 }
  0x20   :  { %425 = vmatpush.bf16.msra.mxu1 %v2984_v22  ;;  %438 = vmatpush.bf16.msra.mxu2 %v3012_v35  ;;  %v2988_v43 = vor.u32 %v4235_v40, %v2987_v39  ;;  %v4232_v44 = vld [vmem:[#allocation5 + $0x12c] sm:$0xf]  ;;  %v2989_v45 = vld [vmem:[#allocation5 + $0x140] sm:$0xf0]  ;;  %v2963_v48 = vld [vmem:[#allocation5 + $0xf8] sm:$0xf]  ;;  %v2936_v51 = vor.u32 %v4219_v38, %v2933_v42 }
  0x21   :  { %452 = vmatpush.bf16.msra.mxu3 %v3016_v36  ;;  %v2992_v46 = vor.u32 %v4232_v44, %v2989_v45  ;;  %v4229_v49 = vld [vmem:[#allocation5 + $0x10c] sm:$0xf0]  ;;  %v4226_v50 = vld [vmem:[#allocation5 + $0xfc] sm:$0xf]  ;;  %v4216_v53 = vld [vmem:[#allocation5 + $0xa4] sm:$0xf0] }
  0x22   :  { %v2907_v52 = vld [vmem:[#allocation5 + $0x90] sm:$0xf]  ;;  %v2965_v54 = vld [vmem:[#allocation5 + $0x110] sm:$0xf0]  ;;  %v2909_v56 = vld [vmem:[#allocation5 + $0xa8] sm:$0xf0]  ;;  %v2964_v57 = vor.u32 %v4229_v49, %v2963_v48 }
  0x23   :  { %412 = vmatpush.bf16.msra.mxu0 %v2956_v32  ;;  %v4213_v55 = vld [vmem:[#allocation5 + $0x94] sm:$0xf]  ;;  %v2968_v58 = vor.u32 %v4226_v50, %v2965_v54  ;;  %v2939_v59 = vld [vmem:[#allocation5 + $0xc8] sm:$0xf]  ;;  %v4223_v60 = vld [vmem:[#allocation5 + $0xdc] sm:$0xf0]  ;;  %v2908_v61 = vor.u32 %v4216_v53, %v2907_v52 }
  0x24   :  { %426 = vmatpush.bf16.msra.mxu1 %v2960_v37  ;;  %439 = vmatpush.bf16.msra.mxu2 %v2988_v43  ;;  %v4220_v62 = vld [vmem:[#allocation5 + $0xcc] sm:$0xf]  ;;  %v2941_v63 = vld [vmem:[#allocation5 + $0xe0] sm:$0xf0]  ;;  %v2912_v0 = vor.u32 %v4213_v55, %v2909_v56  ;;  %v2883_v1 = vld [vmem:[#allocation5 + $0x60] sm:$0xf]  ;;  %v2940_v5 = vor.u32 %v4223_v60, %v2939_v59 }
  0x25   :  { %105 = vperm.xlu0 %4554, %v4540_v41   ;;  %453 = vmatpush.bf16.msra.mxu3 %v2992_v46  ;;  %v4210_v2 = vld [vmem:[#allocation5 + $0x74] sm:$0xf0]  ;;  %v4207_v3 = vld [vmem:[#allocation5 + $0x64] sm:$0xf]  ;;  %v2885_v4 = vld [vmem:[#allocation5 + $0x78] sm:$0xf0]  ;;  %v2944_v6 = vor.u32 %v4220_v62, %v2941_v63 }
  0x26   :  { %v2915_v7 = vld [vmem:[#allocation5 + $0x98] sm:$0xf]  ;;  %v4217_v8 = vld [vmem:[#allocation5 + $0xac] sm:$0xf0]  ;;  %v2884_v9 = vor.u32 %v4210_v2, %v2883_v1  ;;  %v4214_v10 = vld [vmem:[#allocation5 + $0x9c] sm:$0xf]  ;;  %v2888_v12 = vor.u32 %v4207_v3, %v2885_v4 }
  0x27   :  { %413 = vmatpush.bf16.msra.mxu0 %v2932_v47  ;;  %v2917_v11 = vld [vmem:[#allocation5 + $0xb0] sm:$0xf0]  ;;  %v2859_v13 = vld [vmem:[#allocation5 + $0x30] sm:$0xf]  ;;  %v4204_v14 = vld [vmem:[#allocation5 + $0x44] sm:$0xf0]  ;;  %v2916_v17 = vor.u32 %v4217_v8, %v2915_v7 }
  0x28   :  { %427 = vmatpush.bf16.msra.mxu1 %v2936_v51  ;;  %440 = vmatpush.bf16.msra.mxu2 %v2964_v57  ;;  %v4201_v15 = vld [vmem:[#allocation5 + $0x34] sm:$0xf]  ;;  %v2861_v16 = vld [vmem:[#allocation5 + $0x48] sm:$0xf0]  ;;  %v2920_v18 = vor.u32 %v4214_v10, %v2917_v11  ;;  %v2891_v19 = vld [vmem:[#allocation5 + $0x68] sm:$0xf]  ;;  %v2860_v21 = vor.u32 %v4204_v14, %v2859_v13 }
  0x29   :  { %454 = vmatpush.bf16.msra.mxu3 %v2968_v58  ;;  %v4211_v20 = vld [vmem:[#allocation5 + $0x7c] sm:$0xf0]  ;;  %v4208_v22 = vld [vmem:[#allocation5 + $0x6c] sm:$0xf]  ;;  %v2893_v23 = vld [vmem:[#allocation5 + $0x80] sm:$0xf0]  ;;  %v2864_v24 = vor.u32 %v4201_v15, %v2861_v16 }
  0x2a   :  { %v2835_v25 = vld [vmem:[#allocation5] sm:$0xf]  ;;  %v4198_v26 = vld [vmem:[#allocation5 + $0x14] sm:$0xf0]  ;;  %v4195_v27 = vld [vmem:[#allocation5 + $0x4] sm:$0xf]  ;;  %v2892_v31 = vor.u32 %v4211_v20, %v2891_v19  ;;  %v2896_v34 = vor.u32 %v4208_v22, %v2893_v23 }
  0x2b   :  { %414 = vmatpush.bf16.msra.mxu0 %v2908_v61  ;;  %v2837_v28 = vld [vmem:[#allocation5 + $0x18] sm:$0xf0]  ;;  %v3019_v29 = vld [vmem:[#allocation5 + $0x160] sm:$0xf]  ;;  %v4242_v30 = vld [vmem:[#allocation5 + $0x174] sm:$0xf0]  ;;  %v2836_v35 = vor.u32 %v4198_v26, %v2835_v25 }
  0x2c   :  { %428 = vmatpush.bf16.msra.mxu1 %v2912_v0  ;;  %441 = vmatpush.bf16.msra.mxu2 %v2940_v5  ;;  %v4239_v32 = vld [vmem:[#allocation5 + $0x164] sm:$0xf]  ;;  %v3021_v33 = vld [vmem:[#allocation5 + $0x178] sm:$0xf0]  ;;  %v2840_v36 = vor.u32 %v4195_v27, %v2837_v28  ;;  %v3020_v37 = vor.u32 %v4242_v30, %v3019_v29  ;;  %v2995_v39 = vld [vmem:[#allocation5 + $0x130] sm:$0xf] }
  0x2d   :  { %455 = vmatpush.bf16.msra.mxu3 %v2944_v6  ;;  %v3024_v38 = vor.u32 %v4239_v32, %v3021_v33  ;;  %v4236_v40 = vld [vmem:[#allocation5 + $0x144] sm:$0xf0]  ;;  %v4233_v41 = vld [vmem:[#allocation5 + $0x134] sm:$0xf]  ;;  %v2997_v42 = vld [vmem:[#allocation5 + $0x148] sm:$0xf0] }
  0x2e   :  { %v2996_v43 = vor.u32 %v4236_v40, %v2995_v39  ;;  %v3000_v44 = vor.u32 %v4233_v41, %v2997_v42  ;;  %v2867_v45 = vld [vmem:[#allocation5 + $0x38] sm:$0xf]  ;;  %v4205_v46 = vld [vmem:[#allocation5 + $0x4c] sm:$0xf0]  ;;  %v4202_v47 = vld [vmem:[#allocation5 + $0x3c] sm:$0xf] }
  0x2f   :  { %415 = vmatpush.bf16.msra.mxu0 %v2884_v9  ;;  %v2868_v48 = vor.u32 %v4205_v46, %v2867_v45  ;;  %v2869_v49 = vld [vmem:[#allocation5 + $0x50] sm:$0xf0]  ;;  %v2971_v50 = vld [vmem:[#allocation5 + $0x100] sm:$0xf]  ;;  %v4230_v51 = vld [vmem:[#allocation5 + $0x114] sm:$0xf0] }
  0x30   :  { %429 = vmatpush.bf16.msra.mxu1 %v2888_v12  ;;  %442 = vmatpush.bf16.msra.mxu2 %v2916_v17  ;;  %v2872_v52 = vor.u32 %v4202_v47, %v2869_v49  ;;  %v2972_v53 = vor.u32 %v4230_v51, %v2971_v50  ;;  %v4227_v54 = vld [vmem:[#allocation5 + $0x104] sm:$0xf]  ;;  %v2973_v55 = vld [vmem:[#allocation5 + $0x118] sm:$0xf0]  ;;  %v2843_v56 = vld [vmem:[#allocation5 + $0x8] sm:$0xf]  ;;  %v99_v47 = vlaneseq }
  0x31   :  { %456 = vmatpush.bf16.msra.mxu3 %v2920_v18  ;;  %v2976_v57 = vor.u32 %v4227_v54, %v2973_v55  ;;  %v4199_v58 = vld [vmem:[#allocation5 + $0x1c] sm:$0xf0]  ;;  %v4196_v59 = vld [vmem:[#allocation5 + $0xc] sm:$0xf]  ;;  %v2845_v60 = vld [vmem:[#allocation5 + $0x20] sm:$0xf0] }
  0x32   :  { %v2844_v61 = vor.u32 %v4199_v58, %v2843_v56  ;;  %v2848_v62 = vor.u32 %v4196_v59, %v2845_v60  ;;  %v2947_v63 = vld [vmem:[#allocation5 + $0xd0] sm:$0xf]  ;;  %v4224_v0 = vld [vmem:[#allocation5 + $0xe4] sm:$0xf0]  ;;  %v4221_v1 = vld [vmem:[#allocation5 + $0xd4] sm:$0xf] }
  0x33   :  { %416 = vmatpush.bf16.msra.mxu0 %v2860_v21  ;;  %v2948_v2 = vor.u32 %v4224_v0, %v2947_v63  ;;  %v2949_v3 = vld [vmem:[#allocation5 + $0xe8] sm:$0xf0]  ;;  %v2923_v5 = vld [vmem:[#allocation5 + $0xa0] sm:$0xf]  ;;  %v4218_v6 = vld [vmem:[#allocation5 + $0xb4] sm:$0xf0] }
  0x34   :  { %430 = vmatpush.bf16.msra.mxu1 %v2864_v24  ;;  %443 = vmatpush.bf16.msra.mxu2 %v2892_v31  ;;  %v2952_v4 = vor.u32 %v4221_v1, %v2949_v3  ;;  %v4215_v7 = vld [vmem:[#allocation5 + $0xa4] sm:$0xf]  ;;  %v2924_v8 = vor.u32 %v4218_v6, %v2923_v5  ;;  %v2925_v9 = vld [vmem:[#allocation5 + $0xb8] sm:$0xf0]  ;;  %v2899_v11 = vld [vmem:[#allocation5 + $0x70] sm:$0xf] }
  0x35   :  { %457 = vmatpush.bf16.msra.mxu3 %v2896_v34  ;;  %v2928_v10 = vor.u32 %v4215_v7, %v2925_v9  ;;  %v4212_v12 = vld [vmem:[#allocation5 + $0x84] sm:$0xf0]  ;;  %v4209_v13 = vld [vmem:[#allocation5 + $0x74] sm:$0xf]  ;;  %v2901_v15 = vld [vmem:[#allocation5 + $0x88] sm:$0xf0] }
  0x36   :  { %v2900_v14 = vor.u32 %v4212_v12, %v2899_v11  ;;  %v2904_v16 = vor.u32 %v4209_v13, %v2901_v15  ;;  %v2875_v17 = vld [vmem:[#allocation5 + $0x40] sm:$0xf]  ;;  %v4206_v18 = vld [vmem:[#allocation5 + $0x54] sm:$0xf0]  ;;  %v4203_v19 = vld [vmem:[#allocation5 + $0x44] sm:$0xf] }
  0x37   :  { %417 = vmatpush.bf16.msra.mxu0 %v2836_v35  ;;  %v2877_v20 = vld [vmem:[#allocation5 + $0x58] sm:$0xf0]  ;;  %v2876_v21 = vor.u32 %v4206_v18, %v2875_v17  ;;  %v2851_v23 = vld [vmem:[#allocation5 + $0x10] sm:$0xf]  ;;  %v4200_v24 = vld [vmem:[#allocation5 + $0x24] sm:$0xf0] }
  0x38   :  { %431 = vmatpush.bf16.msra.mxu1 %v2840_v36  ;;  %444 = vmatpush.bf16.msra.mxu2 %v2868_v48  ;;  %v2880_v22 = vor.u32 %v4203_v19, %v2877_v20  ;;  %v4197_v25 = vld [vmem:[#allocation5 + $0x14] sm:$0xf]  ;;  %v2853_v26 = vld [vmem:[#allocation5 + $0x28] sm:$0xf0]  ;;  %v2852_v27 = vor.u32 %v4200_v24, %v2851_v23  ;;  %v3213_v29 = vld [vmem:[#allocation7 + $0x150] sm:$0xf] }
  0x39   :  { %458 = vmatpush.bf16.msra.mxu3 %v2872_v52  ;;  %v2856_v28 = vor.u32 %v4197_v25, %v2853_v26  ;;  %v4288_v30 = vld [vmem:[#allocation7 + $0x164] sm:$0xf0]  ;;  %v3405_v31 = vld [vmem:[#allocation7 + $0x2d0] sm:$0xf]  ;;  %v3189_v34 = vld [vmem:[#allocation7 + $0x120] sm:$0xf] }
  0x3a   :  { %v3214_v32 = vor.u32 %v4288_v30, %v3213_v29  ;;  %v4336_v33 = vld [vmem:[#allocation7 + $0x2e4] sm:$0xf0]  ;;  %v4282_v35 = vld [vmem:[#allocation7 + $0x134] sm:$0xf0]  ;;  %v3165_v41 = vld [vmem:[#allocation7 + $0xf0] sm:$0xf] }
  0x3b   :  { %466 = vmatpush.bf16.msrb.mxu0 %v3020_v37  ;;  %v3406_v36 = vor.u32 %v4336_v33, %v3405_v31  ;;  %v3381_v37 = vld [vmem:[#allocation7 + $0x2a0] sm:$0xf]  ;;  %v3190_v39 = vor.u32 %v4282_v35, %v3189_v34  ;;  %v4276_v42 = vld [vmem:[#allocation7 + $0x104] sm:$0xf0]  ;;  %v3357_v45 = vld [vmem:[#allocation7 + $0x270] sm:$0xf] }
  0x3c   :  { %480 = vmatpush.bf16.msrb.mxu1 %v3024_v38  ;;  %445 = vmatpush.bf16.msra.mxu2 %v2844_v61  ;;  %v4330_v38 = vld [vmem:[#allocation7 + $0x2b4] sm:$0xf0]  ;;  %v4324_v46 = vld [vmem:[#allocation7 + $0x284] sm:$0xf0]  ;;  %v3166_v48 = vor.u32 %v4276_v42, %v3165_v41  ;;  %v3141_v52 = vld [vmem:[#allocation7 + $0xc0] sm:$0xf] }
  0x3d   :  { %459 = vmatpush.bf16.msra.mxu3 %v2848_v62  ;;  %v3382_v40 = vor.u32 %v4330_v38, %v3381_v37  ;;  %v3358_v51 = vor.u32 %v4324_v46, %v3357_v45  ;;  %v100_v54 = vand.u32 127, %v99_v47  ;;  %v3597_v55 = vld [vmem:[#allocation7 + $0x450] sm:$0xf]  ;;  %v4384_v56 = vld [vmem:[#allocation7 + $0x464] sm:$0xf0]  ;;  %s2818_s21 = sshll.u32 %s4943_s5, 4  ;;  %s2819_s21 = int_to_ptr.hbm [resolvable:$true] %s2818_s21 }
  0x3e   :  { %v4432_v58 = vld [vmem:[#allocation7 + $0x5e4] sm:$0xf0]  ;;  %v3333_v60 = vld [vmem:[#allocation7 + $0x240] sm:$0xf]  ;;  %v4318_v62 = vld [vmem:[#allocation7 + $0x254] sm:$0xf0] }
  0x3f   :  { %467 = vmatpush.bf16.msrb.mxu0 %v2996_v43  ;;  %v3117_v63 = vld [vmem:[#allocation7 + $0x90] sm:$0xf]  ;;  %v4264_v0 = vld [vmem:[#allocation7 + $0xa4] sm:$0xf0]  ;;  %v4378_v5 = vld [vmem:[#allocation7 + $0x434] sm:$0xf0]  ;;  %v3334_v9 = vor.u32 %v4318_v62, %v3333_v60 }
  0x40   :  { %481 = vmatpush.bf16.msrb.mxu1 %v3000_v44  ;;  %2242 = vmatpush.bf16.msrb.mxu2 %v3214_v32  ;;  %v3765_v6 = vld [vmem:[#allocation7 + $0x5a0] sm:$0xf]  ;;  %v3309_v11 = vld [vmem:[#allocation7 + $0x210] sm:$0xf]  ;;  %v4312_v12 = vld [vmem:[#allocation7 + $0x224] sm:$0xf0] }
  0x41   :  { %2256 = vmatpush.bf16.msrb.mxu3 %v3406_v36  ;;  %v3093_v13 = vld [vmem:[#allocation7 + $0x60] sm:$0xf]  ;;  %v3549_v17 = vld [vmem:[#allocation7 + $0x3f0] sm:$0xf]  ;;  %v4372_v18 = vld [vmem:[#allocation7 + $0x404] sm:$0xf0] }
  0x42   :  { %v3741_v19 = vld [vmem:[#allocation7 + $0x570] sm:$0xf]  ;;  %v4420_v20 = vld [vmem:[#allocation7 + $0x584] sm:$0xf0]  ;;  %v3285_v23 = vld [vmem:[#allocation7 + $0x1e0] sm:$0xf] }
  0x43   :  { %468 = vmatpush.bf16.msrb.mxu0 %v2972_v53  ;;  %v4270_v53 = vld [vmem:[#allocation7 + $0xd4] sm:$0xf0]  ;;  %v3069_v25 = vld [vmem:[#allocation7 + $0x30] sm:$0xf]  ;;  %v4252_v26 = vld [vmem:[#allocation7 + $0x44] sm:$0xf0] }
  0x44   :  { %482 = vmatpush.bf16.msrb.mxu1 %v2976_v57  ;;  %2243 = vmatpush.bf16.msrb.mxu2 %v3190_v39  ;;  %v3789_v57 = vld [vmem:[#allocation7 + $0x5d0] sm:$0xf]  ;;  %v3142_v59 = vor.u32 %v4270_v53, %v3141_v52  ;;  %v4306_v24 = vld [vmem:[#allocation7 + $0x1f4] sm:$0xf0]  ;;  %v3525_v29 = vld [vmem:[#allocation7 + $0x3c0] sm:$0xf]  ;;  %v3070_v34 = vor.u32 %v4252_v26, %v3069_v25 }
  0x45   :  { %2257 = vmatpush.bf16.msrb.mxu3 %v3382_v40  ;;  %v3790_v3 = vor.u32 %v4432_v58, %v3789_v57  ;;  %v4366_v30 = vld [vmem:[#allocation7 + $0x3d4] sm:$0xf0]  ;;  %v3717_v31 = vld [vmem:[#allocation7 + $0x540] sm:$0xf]  ;;  %v3286_v33 = vor.u32 %v4306_v24, %v3285_v23  ;;  %v3261_v35 = vld [vmem:[#allocation7 + $0x1b0] sm:$0xf] }
  0x46   :  { %v4414_v32 = vld [vmem:[#allocation7 + $0x554] sm:$0xf0]  ;;  %v4300_v36 = vld [vmem:[#allocation7 + $0x1c4] sm:$0xf0]  ;;  %v3045_v37 = vld [vmem:[#allocation7] sm:$0xf]  ;;  %v3526_v39 = vor.u32 %v4366_v30, %v3525_v29 }
  0x47   :  { %469 = vmatpush.bf16.msrb.mxu0 %v2948_v2  ;;  %v3598_v2 = vor.u32 %v4384_v56, %v3597_v55  ;;  %v4246_v38 = vld [vmem:[#allocation7 + $0x14] sm:$0xf0]  ;;  %v3718_v40 = vor.u32 %v4414_v32, %v3717_v31  ;;  %v3501_v41 = vld [vmem:[#allocation7 + $0x390] sm:$0xf]  ;;  %v4408_v46 = vld [vmem:[#allocation7 + $0x524] sm:$0xf0]  ;;  %v3262_v47 = vor.u32 %v4300_v36, %v3261_v35 }
  0x48   :  { %483 = vmatpush.bf16.msrb.mxu1 %v2952_v4  ;;  %2244 = vmatpush.bf16.msrb.mxu2 %v3166_v48  ;;  %v3573_v4 = vld [vmem:[#allocation7 + $0x420] sm:$0xf]  ;;  %v3981_v42 = vld [vmem:[#allocation7 + $0x750] sm:$0xf]  ;;  %v3046_v48 = vor.u32 %v4246_v38, %v3045_v37  ;;  %v4528_v53 = vld [vmem:[#allocation7 + $0x8e4] sm:$0xf0] }
  0x49   :  { %2258 = vmatpush.bf16.msrb.mxu3 %v3358_v51  ;;  %v3574_v15 = vor.u32 %v4378_v5, %v3573_v4  ;;  %v3693_v45 = vld [vmem:[#allocation7 + $0x510] sm:$0xf]  ;;  %v3477_v56 = vld [vmem:[#allocation7 + $0x360] sm:$0xf]  ;;  %v4474_v58 = vld [vmem:[#allocation7 + $0x734] sm:$0xf0] }
  0x4a   :  { %v4173_v52 = vld [vmem:[#allocation7 + $0x8d0] sm:$0xf]  ;;  %v3694_v55 = vor.u32 %v4408_v46, %v3693_v45  ;;  %v3957_v57 = vld [vmem:[#allocation7 + $0x720] sm:$0xf]  ;;  %v4402_v62 = vld [vmem:[#allocation7 + $0x4f4] sm:$0xf0] }
  0x4b   :  { %470 = vmatpush.bf16.msrb.mxu0 %v2924_v8  ;;  %v4426_v8 = vld [vmem:[#allocation7 + $0x5b4] sm:$0xf0]  ;;  %v3669_v60 = vld [vmem:[#allocation7 + $0x4e0] sm:$0xf]  ;;  %v4285_v23 = vld [vmem:[#allocation7 + $0x154] sm:$0xf] }
  0x4c   :  { %484 = vmatpush.bf16.msrb.mxu1 %v2928_v10  ;;  %2245 = vmatpush.bf16.msrb.mxu2 %v3142_v59  ;;  %v3118_v10 = vor.u32 %v4264_v0, %v3117_v63  ;;  %v4354_v59 = vld [vmem:[#allocation7 + $0x374] sm:$0xf0]  ;;  %v4174_v0 = vor.u32 %v4528_v53, %v4173_v52  ;;  %v3670_v5 = vor.u32 %v4402_v62, %v3669_v60  ;;  %v3215_v24 = vld [vmem:[#allocation7 + $0x168] sm:$0xf0]  ;;  %v4333_v25 = vld [vmem:[#allocation7 + $0x2d4] sm:$0xf] }
  0x4d   :  { %2259 = vmatpush.bf16.msrb.mxu3 %v3334_v9  ;;  %v3478_v4 = vor.u32 %v4354_v59, %v3477_v56  ;;  %v4468_v9 = vld [vmem:[#allocation7 + $0x704] sm:$0xf0]  ;;  %v3407_v26 = vld [vmem:[#allocation7 + $0x2e8] sm:$0xf0]  ;;  %v4101_v29 = vld [vmem:[#allocation7 + $0x840] sm:$0xf]  ;;  %v3218_v35 = vor.u32 %v4285_v23, %v3215_v24 }
  0x4e   :  { %v4510_v30 = vld [vmem:[#allocation7 + $0x854] sm:$0xf0]  ;;  %v3410_v36 = vor.u32 %v4333_v25, %v3407_v26  ;;  %v4279_v37 = vld [vmem:[#allocation7 + $0x124] sm:$0xf]  ;;  %v3191_v38 = vld [vmem:[#allocation7 + $0x138] sm:$0xf0] }
  0x4f   :  { %471 = vmatpush.bf16.msrb.mxu0 %v2900_v14  ;;  %v4258_v14 = vld [vmem:[#allocation7 + $0x74] sm:$0xf0]  ;;  %v3194_v45 = vor.u32 %v4279_v37, %v3191_v38  ;;  %v4315_v56 = vld [vmem:[#allocation7 + $0x244] sm:$0xf]  ;;  %v3861_v60 = vld [vmem:[#allocation7 + $0x660] sm:$0xf] }
  0x50   :  { %485 = vmatpush.bf16.msrb.mxu1 %v2904_v16  ;;  %v3766_v16 = vor.u32 %v4426_v8, %v3765_v6  ;;  %2246 = vmatpush.bf16.msrb.mxu2 %v3118_v10  ;;  %v3453_v6 = vld [vmem:[#allocation7 + $0x330] sm:$0xf]  ;;  %v4348_v10 = vld [vmem:[#allocation7 + $0x344] sm:$0xf0]  ;;  %v4450_v62 = vld [vmem:[#allocation7 + $0x674] sm:$0xf0] }
  0x51   :  { %v3933_v8 = vld [vmem:[#allocation7 + $0x6f0] sm:$0xf]  ;;  %v4486_v24 = vld [vmem:[#allocation7 + $0x794] sm:$0xf0]  ;;  %v4249_v26 = vld [vmem:[#allocation7 + $0x34] sm:$0xf] }
  0x52   :  { %v3934_v7 = vor.u32 %v4468_v9, %v3933_v8  ;;  %v3311_v8 = vld [vmem:[#allocation7 + $0x228] sm:$0xf0] }
  0x53   :  { %472 = vmatpush.bf16.msrb.mxu0 %v2876_v21  ;;  %v3310_v21 = vor.u32 %v4312_v12, %v3309_v11  ;;  %v3645_v11 = vld [vmem:[#allocation7 + $0x4b0] sm:$0xf]  ;;  %v4396_v12 = vld [vmem:[#allocation7 + $0x4c4] sm:$0xf0] }
  0x54   :  { %486 = vmatpush.bf16.msrb.mxu1 %v2880_v22  ;;  %v3094_v22 = vor.u32 %v4258_v14, %v3093_v13  ;;  %v4125_v14 = vld [vmem:[#allocation7 + $0x870] sm:$0xf] }
  0x55   :  { %2260 = vmatpush.bf16.msrb.mxu3 %v3310_v21  ;;  %v3621_v21 = vld [vmem:[#allocation7 + $0x480] sm:$0xf] }
  0x56   :  { %2247 = vmatpush.bf16.msrb.mxu2 %v3094_v22  ;;  %v4390_v22 = vld [vmem:[#allocation7 + $0x494] sm:$0xf0] }
  0x57   :  { %473 = vmatpush.bf16.msrb.mxu0 %v2852_v27  ;;  %v3550_v27 = vor.u32 %v4372_v18, %v3549_v17  ;;  %v3646_v17 = vor.u32 %v4396_v12, %v3645_v11  ;;  %v4342_v18 = vld [vmem:[#allocation7 + $0x314] sm:$0xf0]  ;;  %v3622_v32 = vor.u32 %v4390_v22, %v3621_v21  ;;  %v4444_v11 = vld [vmem:[#allocation7 + $0x644] sm:$0xf0]  ;;  %v4029_v12 = vld [vmem:[#allocation7 + $0x7b0] sm:$0xf] }
  0x58   :  { %487 = vmatpush.bf16.msrb.mxu1 %v2856_v28  ;;  %v3742_v28 = vor.u32 %v4420_v20, %v3741_v19  ;;  %v3909_v19 = vld [vmem:[#allocation7 + $0x6c0] sm:$0xf]  ;;  %v4462_v20 = vld [vmem:[#allocation7 + $0x6d4] sm:$0xf0] }
  0x59   :  { %2261 = vmatpush.bf16.msrb.mxu3 %v3286_v33  ;;  %v3885_v33 = vld [vmem:[#allocation7 + $0x690] sm:$0xf]  ;;  %v4438_v21 = vld [vmem:[#allocation7 + $0x614] sm:$0xf0]  ;;  %v4005_v22 = vld [vmem:[#allocation7 + $0x780] sm:$0xf] }
  0x5a   :  { %2248 = vmatpush.bf16.msrb.mxu2 %v3070_v34  ;;  %v4456_v34 = vld [vmem:[#allocation7 + $0x6a4] sm:$0xf0]  ;;  %v4006_v25 = vor.u32 %v4486_v24, %v4005_v22  ;;  %v4465_v22 = vld [vmem:[#allocation7 + $0x6f4] sm:$0xf] }
  0x5d   :  { %2262 = vmatpush.bf16.msrb.mxu3 %v3262_v47  ;;  %v4273_v47 = vld [vmem:[#allocation7 + $0xf4] sm:$0xf] }
  0x5e   :  { %2249 = vmatpush.bf16.msrb.mxu2 %v3046_v48  ;;  %v3167_v48 = vld [vmem:[#allocation7 + $0x108] sm:$0xf0] }
  0x5f   :  { %v3170_v52 = vor.u32 %v4273_v47, %v3167_v48 }
  0x8c   :  { %v4558_v44 = vpop.permute.xlu1 %4557 }
  0x8d   :  { %v4560_v49 = vunpack.i.h.bf16 %v4558_v44  ;;  %v4559_v50 = vunpack.i.l.bf16 %v4558_v44  ;;  %v4360_v44 = vld [vmem:[#allocation7 + $0x3a4] sm:$0xf0] }
  0x8f   :  { %v103_v43 = vpop.permute.xlu0 %102  ;;  %v4802_v61 = vpack.c.bf16 %v4560_v49, %v4559_v50  ;;  %v3237_v49 = vld [vmem:[#allocation7 + $0x180] sm:$0xf]  ;;  %v4294_v50 = vld [vmem:[#allocation7 + $0x194] sm:$0xf0] }
  0x90   :  { %vm107_vm2 = vcmp.eq.s32.totalorder %v103_v43, %v100_v54  ;;  %v4480_v43 = vld [vmem:[#allocation7 + $0x764] sm:$0xf0]  ;;  %v3238_v63 = vor.u32 %v4294_v50, %v3237_v49  ;;  %v4321_v49 = vld [vmem:[#allocation7 + $0x274] sm:$0xf]  ;;  %v3359_v50 = vld [vmem:[#allocation7 + $0x288] sm:$0xf0] }
  0x91   :  { %v3982_v51 = vor.u32 %v4480_v43, %v3981_v42  ;;  %v3886_v42 = vor.u32 %v4456_v34, %v3885_v33  ;;  %v4077_v43 = vld [vmem:[#allocation7 + $0x810] sm:$0xf]  ;;  %v3362_v53 = vor.u32 %v4321_v49, %v3359_v50  ;;  %v3047_v33 = vld [vmem:[#allocation7 + $0x18] sm:$0xf0]  ;;  %v4375_v50 = vld [vmem:[#allocation7 + $0x424] sm:$0xf] }
  0x92   :  { %2263 = vmatpush.bf16.msrb.mxu3 %v3238_v63  ;;  %v4053_v63 = vld [vmem:[#allocation7 + $0x7e0] sm:$0xf] }
  0x97   :  { %v106_v1 = vpop.permute.xlu0 %105 }
  0x98   :  { %vm108_vm3 = vcmp.eq.s32.totalorder %v106_v1, %v100_v54  ;;  %v3502_v54 = vor.u32 %v4360_v44, %v3501_v41  ;;  %v3958_v1 = vor.u32 %v4474_v58, %v3957_v57  ;;  %v4102_v41 = vor.u32 %v4510_v30, %v4101_v29  ;;  %v4504_v44 = vld [vmem:[#allocation7 + $0x824] sm:$0xf0]  ;;  %v3335_v58 = vld [vmem:[#allocation7 + $0x258] sm:$0xf0]  ;;  %v3263_v29 = vld [vmem:[#allocation7 + $0x1c8] sm:$0xf0] }
  0x99   :  { %vm4804_vm4 = vmpackc.low %vm108_vm3, %vm107_vm2  ;;  %v3338_v59 = vor.u32 %v4315_v56, %v3335_v58  ;;  %v4477_v56 = vld [vmem:[#allocation7 + $0x754] sm:$0xf] }
  0x9a   :  { %3027 = vmatmul.msk.bf16.vlgmr.msra.gmra.mxu0 %vm4804_vm4, %v4802_v61  ;;  %3030 = vmatmul.msk.bf16.vlgmr.msra.gmra.mxu1 %vm4804_vm4, %v4802_v61  ;;  %v4525_v58 = vld [vmem:[#allocation7 + $0x8d4] sm:$0xf] }
  0x9b   :  { %3033 = vmatmul.msk.bf16.vlgmr.msra.gmra.mxu2 %vm4804_vm4, %v4802_v61  ;;  %3036 = vmatmul.msk.bf16.vlgmr.msra.gmra.mxu3 %vm4804_vm4, %v4802_v61 }
  0x9c   :  { %2270 = vmatpush.bf16.msra.mxu0 %v3598_v2  ;;  %2284 = vmatpush.bf16.msra.mxu1 %v3790_v3  ;;  %v4149_v2 = vld [vmem:[#allocation7 + $0x8a0] sm:$0xf]  ;;  %v4522_v3 = vld [vmem:[#allocation7 + $0x8b4] sm:$0xf0] }
  0x9d   :  { %2298 = vmatpush.bf16.msra.mxu2 %v3982_v51  ;;  %2312 = vmatpush.bf16.msra.mxu3 %v4174_v0  ;;  %v4150_v13 = vor.u32 %v4522_v3, %v4149_v2  ;;  %v4078_v51 = vor.u32 %v4504_v44, %v4077_v43  ;;  %v3862_v0 = vor.u32 %v4450_v62, %v3861_v60  ;;  %v4261_v2 = vld [vmem:[#allocation7 + $0x94] sm:$0xf]  ;;  %v3119_v3 = vld [vmem:[#allocation7 + $0xa8] sm:$0xf0] }
  0x9e   :  { %v3791_v43 = vld [vmem:[#allocation7 + $0x5e8] sm:$0xf0] }
  0x9f   :  { %v4175_v62 = vld [vmem:[#allocation7 + $0x8e8] sm:$0xf0] }
  0xa0   :  { %2271 = vmatpush.bf16.msra.mxu0 %v3574_v15  ;;  %2285 = vmatpush.bf16.msra.mxu1 %v3766_v16  ;;  %v4516_v15 = vld [vmem:[#allocation7 + $0x884] sm:$0xf0]  ;;  %v3454_v16 = vor.u32 %v4348_v10, %v3453_v6  ;;  %v4309_v6 = vld [vmem:[#allocation7 + $0x214] sm:$0xf]  ;;  %v3837_v10 = vld [vmem:[#allocation7 + $0x630] sm:$0xf] }
  0xa1   :  { %2299 = vmatpush.bf16.msra.mxu2 %v3958_v1  ;;  %2313 = vmatpush.bf16.msra.mxu3 %v4150_v13  ;;  %v4498_v1 = vld [vmem:[#allocation7 + $0x7f4] sm:$0xf0]  ;;  %v3314_v9 = vor.u32 %v4309_v6, %v3311_v8  ;;  %v3838_v13 = vor.u32 %v4444_v11, %v3837_v10  ;;  %v4178_v6 = vor.u32 %v4525_v58, %v4175_v62  ;;  %v3959_v10 = vld [vmem:[#allocation7 + $0x738] sm:$0xf0]  ;;  %v4345_v58 = vld [vmem:[#allocation7 + $0x334] sm:$0xf] }
  0xa2   :  { %v3647_v62 = vld [vmem:[#allocation7 + $0x4c8] sm:$0xf0] }
  0xa4   :  { %2272 = vmatpush.bf16.msra.mxu0 %v3550_v27  ;;  %2286 = vmatpush.bf16.msra.mxu1 %v3742_v28  ;;  %v4126_v27 = vor.u32 %v4516_v15, %v4125_v14  ;;  %v3910_v28 = vor.u32 %v4462_v20, %v3909_v19  ;;  %v4255_v14 = vld [vmem:[#allocation7 + $0x64] sm:$0xf]  ;;  %v3095_v15 = vld [vmem:[#allocation7 + $0x78] sm:$0xf0]  ;;  %v3813_v20 = vld [vmem:[#allocation7 + $0x600] sm:$0xf] }
  0xa5   :  { %2300 = vmatpush.bf16.msra.mxu2 %v3934_v7  ;;  %v3814_v23 = vor.u32 %v4438_v21, %v3813_v20 }
  0xa6   :  { %2314 = vmatpush.bf16.msra.mxu3 %v4126_v27  ;;  %v3071_v27 = vld [vmem:[#allocation7 + $0x48] sm:$0xf0] }
  0xa7   :  { %v3074_v30 = vor.u32 %v4249_v26, %v3071_v27  ;;  %v4513_v26 = vld [vmem:[#allocation7 + $0x874] sm:$0xf]  ;;  %v4127_v27 = vld [vmem:[#allocation7 + $0x888] sm:$0xf0] }
  0xa8   :  { %2273 = vmatpush.bf16.msra.mxu0 %v3526_v39  ;;  %2287 = vmatpush.bf16.msra.mxu1 %v3718_v40  ;;  %v4327_v39 = vld [vmem:[#allocation7 + $0x2a4] sm:$0xf]  ;;  %v3383_v40 = vld [vmem:[#allocation7 + $0x2b8] sm:$0xf0] }
  0xa9   :  { %2301 = vmatpush.bf16.msra.mxu2 %v3910_v28  ;;  %v3386_v46 = vor.u32 %v4327_v39, %v3383_v40  ;;  %v4297_v28 = vld [vmem:[#allocation7 + $0x1b4] sm:$0xf] }
  0xaa   :  { %3039 = vmatmul.msk.bf16.vlgmr.msrb.gmra.mxu0 %vm4804_vm4, %v4802_v61  ;;  %3042 = vmatmul.msk.bf16.vlgmr.msrb.gmra.mxu1 %vm4804_vm4, %v4802_v61  ;;  %v3429_v61 = vld [vmem:[#allocation7 + $0x300] sm:$0xf]  ;;  %v4381_v40 = vld [vmem:[#allocation7 + $0x454] sm:$0xf] }
  0xab   :  { %v3430_v31 = vor.u32 %v4342_v18, %v3429_v61  ;;  %2315 = vmatpush.bf16.msra.mxu3 %v4102_v41  ;;  %v4492_v61 = vld [vmem:[#allocation7 + $0x7c4] sm:$0xf0]  ;;  %v3287_v18 = vld [vmem:[#allocation7 + $0x1f8] sm:$0xf0]  ;;  %v3599_v41 = vld [vmem:[#allocation7 + $0x468] sm:$0xf0] }
  0xac   :  { %2274 = vmatpush.bf16.msra.mxu0 %v3502_v54  ;;  %2288 = vmatpush.bf16.msra.mxu1 %v3694_v55  ;;  %v4267_v54 = vld [vmem:[#allocation7 + $0xc4] sm:$0xf]  ;;  %v3143_v55 = vld [vmem:[#allocation7 + $0xd8] sm:$0xf0]  ;;  %v4030_v7 = vor.u32 %v4492_v61, %v4029_v12  ;;  %v3602_v48 = vor.u32 %v4381_v40, %v3599_v41 }
  0xad   :  { %2302 = vmatpush.bf16.msra.mxu2 %v3886_v42  ;;  %v3146_v57 = vor.u32 %v4267_v54, %v3143_v55  ;;  %v4429_v42 = vld [vmem:[#allocation7 + $0x5d4] sm:$0xf]  ;;  %v4423_v54 = vld [vmem:[#allocation7 + $0x5a4] sm:$0xf]  ;;  %v3767_v55 = vld [vmem:[#allocation7 + $0x5b8] sm:$0xf0] }
  0xae   :  { %v3794_v49 = vor.u32 %v4429_v42, %v3791_v43  ;;  %v3770_v60 = vor.u32 %v4423_v54, %v3767_v55  ;;  %v4501_v54 = vld [vmem:[#allocation7 + $0x814] sm:$0xf]  ;;  %v4079_v55 = vld [vmem:[#allocation7 + $0x828] sm:$0xf0] }
  0xaf   :  { %2316 = vmatpush.bf16.msra.mxu3 %v4078_v51 }
  0xb0   :  { %2275 = vmatpush.bf16.msra.mxu0 %v3478_v4  ;;  %2289 = vmatpush.bf16.msra.mxu1 %v3670_v5  ;;  %v4054_v4 = vor.u32 %v4498_v1, %v4053_v63  ;;  %v3122_v5 = vor.u32 %v4261_v2, %v3119_v3  ;;  %v4369_v63 = vld [vmem:[#allocation7 + $0x3f4] sm:$0xf]  ;;  %v3743_v2 = vld [vmem:[#allocation7 + $0x588] sm:$0xf0] }
  0xb1   :  { %2303 = vmatpush.bf16.msra.mxu2 %v3862_v0  ;;  %v3551_v0 = vld [vmem:[#allocation7 + $0x408] sm:$0xf0]  ;;  %v4417_v1 = vld [vmem:[#allocation7 + $0x574] sm:$0xf] }
  0xb2   :  { %v3554_v8 = vor.u32 %v4369_v63, %v3551_v0  ;;  %v4082_v0 = vor.u32 %v4501_v54, %v4079_v55  ;;  %v3581_v54 = vld [vmem:[#allocation7 + $0x428] sm:$0xf]  ;;  %v4379_v55 = vld [vmem:[#allocation7 + $0x43c] sm:$0xf0] }
  0xb3   :  { %2317 = vmatpush.bf16.msra.mxu3 %v4054_v4 }
  0xb4   :  { %2276 = vmatpush.bf16.msra.mxu0 %v3454_v16  ;;  %2290 = vmatpush.bf16.msra.mxu1 %v3646_v17  ;;  %v4303_v16 = vld [vmem:[#allocation7 + $0x1e4] sm:$0xf]  ;;  %v3098_v17 = vor.u32 %v4255_v14, %v3095_v15  ;;  %v4151_v15 = vld [vmem:[#allocation7 + $0x8b8] sm:$0xf0] }
  0xb5   :  { %2304 = vmatpush.bf16.msra.mxu2 %v3838_v13  ;;  %v3290_v19 = vor.u32 %v4303_v16, %v3287_v18  ;;  %v4519_v14 = vld [vmem:[#allocation7 + $0x8a4] sm:$0xf] }
  0xb6   :  { %v4363_v16 = vld [vmem:[#allocation7 + $0x3c4] sm:$0xf]  ;;  %v4154_v21 = vor.u32 %v4519_v14, %v4151_v15 }
  0xb7   :  { %2318 = vmatpush.bf16.msra.mxu3 %v4030_v7  ;;  %v3746_v7 = vor.u32 %v4417_v1, %v3743_v2  ;;  %v4411_v18 = vld [vmem:[#allocation7 + $0x544] sm:$0xf]  ;;  %v3863_v2 = vld [vmem:[#allocation7 + $0x678] sm:$0xf0] }
  0xb8   :  { %2277 = vmatpush.bf16.msra.mxu0 %v3430_v31  ;;  %2291 = vmatpush.bf16.msra.mxu1 %v3622_v32  ;;  %v3266_v31 = vor.u32 %v4297_v28, %v3263_v29  ;;  %v4243_v32 = vld [vmem:[#allocation7 + $0x4] sm:$0xf]  ;;  %v4357_v28 = vld [vmem:[#allocation7 + $0x394] sm:$0xf]  ;;  %v3503_v29 = vld [vmem:[#allocation7 + $0x3a8] sm:$0xf0] }
  0xb9   :  { %2305 = vmatpush.bf16.msra.mxu2 %v3814_v23  ;;  %v3050_v34 = vor.u32 %v4243_v32, %v3047_v33  ;;  %v4130_v33 = vor.u32 %v4513_v26, %v4127_v27  ;;  %v3506_v42 = vor.u32 %v4357_v28, %v3503_v29  ;;  %v4447_v1 = vld [vmem:[#allocation7 + $0x664] sm:$0xf]  ;;  %v3197_v26 = vld [vmem:[#allocation7 + $0x128] sm:$0xf]  ;;  %v4283_v27 = vld [vmem:[#allocation7 + $0x13c] sm:$0xf0] }
  0xba   :  { %v3866_v14 = vor.u32 %v4447_v1, %v3863_v2  ;;  %v3389_v28 = vld [vmem:[#allocation7 + $0x2a8] sm:$0xf]  ;;  %v3582_v1 = vor.u32 %v4379_v55, %v3581_v54  ;;  %v3989_v54 = vld [vmem:[#allocation7 + $0x758] sm:$0xf]  ;;  %v4481_v55 = vld [vmem:[#allocation7 + $0x76c] sm:$0xf0] }
  0xbb   :  { %2319 = vmatpush.bf16.msra.mxu3 %v4006_v25  ;;  %v3935_v25 = vld [vmem:[#allocation7 + $0x708] sm:$0xf0] }
  0xbc   :  { %2326 = vmatpush.bf16.msrb.mxu0 %v3218_v35  ;;  %2340 = vmatpush.bf16.msrb.mxu1 %v3410_v36  ;;  %v4291_v35 = vld [vmem:[#allocation7 + $0x184] sm:$0xf]  ;;  %v3239_v36 = vld [vmem:[#allocation7 + $0x198] sm:$0xf0]  ;;  %v3938_v32 = vor.u32 %v4465_v22, %v3935_v25 }
  0xbd   :  { %v3242_v37 = vor.u32 %v4291_v35, %v3239_v36 }
  0xc0   :  { %2327 = vmatpush.bf16.msrb.mxu0 %v3194_v45  ;;  %2341 = vmatpush.bf16.msrb.mxu1 %v3386_v46 }
  0xc4   :  { %2328 = vmatpush.bf16.msrb.mxu0 %v3170_v52  ;;  %2342 = vmatpush.bf16.msrb.mxu1 %v3362_v53  ;;  %v3575_v53 = vld [vmem:[#allocation7 + $0x438] sm:$0xf0] }
  0xc8   :  { %2329 = vmatpush.bf16.msrb.mxu0 %v3146_v57  ;;  %2343 = vmatpush.bf16.msrb.mxu1 %v3338_v59  ;;  %v3983_v57 = vld [vmem:[#allocation7 + $0x768] sm:$0xf0]  ;;  %v3578_v59 = vor.u32 %v4375_v50, %v3575_v53  ;;  %v4453_v50 = vld [vmem:[#allocation7 + $0x694] sm:$0xf] }
  0xc9   :  { %v3887_v53 = vld [vmem:[#allocation7 + $0x6a8] sm:$0xf0] }
  0xca   :  { %v3890_v63 = vor.u32 %v4453_v50, %v3887_v53 }
  0xcc   :  { %2330 = vmatpush.bf16.msrb.mxu0 %v3122_v5  ;;  %2344 = vmatpush.bf16.msrb.mxu1 %v3314_v9  ;;  %v3986_v5 = vor.u32 %v4477_v56, %v3983_v57  ;;  %v4471_v9 = vld [vmem:[#allocation7 + $0x724] sm:$0xf] }
  0xcd   :  { %v3962_v20 = vor.u32 %v4471_v9, %v3959_v10  ;;  %v3431_v9 = vld [vmem:[#allocation7 + $0x318] sm:$0xf0]  ;;  %v4387_v10 = vld [vmem:[#allocation7 + $0x484] sm:$0xf] }
  0xd0   :  { %2331 = vmatpush.bf16.msrb.mxu0 %v3098_v17  ;;  %2345 = vmatpush.bf16.msrb.mxu1 %v3290_v19  ;;  %v3527_v17 = vld [vmem:[#allocation7 + $0x3d8] sm:$0xf0] }
  0xd1   :  { %v3719_v19 = vld [vmem:[#allocation7 + $0x558] sm:$0xf0]  ;;  %v3530_v23 = vor.u32 %v4363_v16, %v3527_v17  ;;  %v3413_v16 = vld [vmem:[#allocation7 + $0x2d8] sm:$0xf]  ;;  %v4337_v17 = vld [vmem:[#allocation7 + $0x2ec] sm:$0xf0] }
  0xd2   :  { %v3722_v24 = vor.u32 %v4411_v18, %v3719_v19  ;;  %v4441_v18 = vld [vmem:[#allocation7 + $0x634] sm:$0xf]  ;;  %v3839_v19 = vld [vmem:[#allocation7 + $0x648] sm:$0xf0]  ;;  %v3414_v25 = vor.u32 %v4337_v17, %v3413_v16  ;;  %v3533_v16 = vld [vmem:[#allocation7 + $0x3c8] sm:$0xf] }
  0xd3   :  { %v3842_v29 = vor.u32 %v4441_v18, %v3839_v19  ;;  %v4367_v17 = vld [vmem:[#allocation7 + $0x3dc] sm:$0xf0]  ;;  %v3725_v18 = vld [vmem:[#allocation7 + $0x548] sm:$0xf] }
  0xd4   :  { %2332 = vmatpush.bf16.msrb.mxu0 %v3074_v30  ;;  %2346 = vmatpush.bf16.msrb.mxu1 %v3266_v31  ;;  %v4405_v30 = vld [vmem:[#allocation7 + $0x514] sm:$0xf]  ;;  %v3695_v31 = vld [vmem:[#allocation7 + $0x528] sm:$0xf0]  ;;  %v4415_v19 = vld [vmem:[#allocation7 + $0x55c] sm:$0xf0] }
  0xd5   :  { %v3698_v43 = vor.u32 %v4405_v30, %v3695_v31  ;;  %v4331_v31 = vld [vmem:[#allocation7 + $0x2bc] sm:$0xf0] }
  0xd8   :  { %2333 = vmatpush.bf16.msrb.mxu0 %v3050_v34  ;;  %2347 = vmatpush.bf16.msrb.mxu1 %v3242_v37  ;;  %v4459_v34 = vld [vmem:[#allocation7 + $0x6c4] sm:$0xf]  ;;  %v3911_v37 = vld [vmem:[#allocation7 + $0x6d8] sm:$0xf0] }
 0x117   :  { %v419_v38 = vpop.f32.mrf.mxu0  ;;  %v433_v39 = vpop.f32.mrf.mxu1 }
 0x11e   :  { %v447_v44 = vpop.f32.mrf.mxu2  ;;  %v461_v45 = vpop.f32.mrf.mxu3 }
 0x11f   :  { %v421_v46 = vpop.f32.mrf.mxu0  ;;  %v435_v47 = vpop.f32.mrf.mxu1 }
 0x120   :  { %v4826_v51 = vpack.c.bf16 %v421_v46, %v419_v38  ;;  %v4828_v52 = vpack.c.bf16 %v435_v47, %v433_v39  ;;  %v4507_v38 = vld [vmem:[#allocation7 + $0x844] sm:$0xf]  ;;  %v4103_v39 = vld [vmem:[#allocation7 + $0x858] sm:$0xf0] }
 0x121   :  { %v4399_v46 = vld [vmem:[#allocation7 + $0x4e4] sm:$0xf]  ;;  %v3671_v47 = vld [vmem:[#allocation7 + $0x4f8] sm:$0xf0] }
 0x122   :  { %2250 = vmatmul.bf16.vlgmr.msrb.gmra.mxu2 %v4826_v51  ;;  %2264 = vmatmul.bf16.vlgmr.msrb.gmra.mxu3 %v4828_v52  ;;  %v3674_v57 = vor.u32 %v4399_v46, %v3671_v47  ;;  %v4277_v47 = vld [vmem:[#allocation7 + $0x10c] sm:$0xf0] }
 0x123   :  { %2354 = vmatpush.bf16.msrb.mxu2 %v3602_v48  ;;  %2368 = vmatpush.bf16.msrb.mxu3 %v3794_v49  ;;  %v3914_v48 = vor.u32 %v4459_v34, %v3911_v37  ;;  %v4106_v49 = vor.u32 %v4507_v38, %v4103_v39  ;;  %v4483_v34 = vld [vmem:[#allocation7 + $0x784] sm:$0xf]  ;;  %v4385_v37 = vld [vmem:[#allocation7 + $0x46c] sm:$0xf0]  ;;  %v3797_v38 = vld [vmem:[#allocation7 + $0x5d8] sm:$0xf] }
 0x124   :  { %v4433_v39 = vld [vmem:[#allocation7 + $0x5ec] sm:$0xf0] }
 0x125   :  { %v3798_v53 = vor.u32 %v4433_v39, %v3797_v38 }
 0x126   :  { %v449_v3 = vpop.f32.mrf.mxu2  ;;  %v463_v4 = vpop.f32.mrf.mxu3 }
 0x127   :  { %v4832_v11 = vpack.c.bf16 %v449_v3, %v447_v44  ;;  %v4834_v12 = vpack.c.bf16 %v463_v4, %v461_v45  ;;  %2355 = vmatpush.bf16.msrb.mxu2 %v3578_v59  ;;  %2369 = vmatpush.bf16.msrb.mxu3 %v3770_v60  ;;  %v475_v13 = vpop.f32.mrf.mxu0  ;;  %v489_v61 = vpop.f32.mrf.mxu1  ;;  %v4351_v44 = vld [vmem:[#allocation7 + $0x364] sm:$0xf]  ;;  %v3479_v45 = vld [vmem:[#allocation7 + $0x378] sm:$0xf0]  ;;  %v3455_v59 = vld [vmem:[#allocation7 + $0x348] sm:$0xf0] }
 0x128   :  { %v3482_v56 = vor.u32 %v4351_v44, %v3479_v45  ;;  %v4393_v60 = vld [vmem:[#allocation7 + $0x4b4] sm:$0xf]  ;;  %v4495_v3 = vld [vmem:[#allocation7 + $0x7e4] sm:$0xf]  ;;  %v4055_v4 = vld [vmem:[#allocation7 + $0x7f8] sm:$0xf0] }
 0x129   :  { %2278 = vmatmul.bf16.vlgmr.msra.gmra.mxu0 %v4832_v11  ;;  %2292 = vmatmul.bf16.vlgmr.msra.gmra.mxu1 %v4834_v12  ;;  %v4058_v15 = vor.u32 %v4495_v3, %v4055_v4  ;;  %v3173_v44 = vld [vmem:[#allocation7 + $0xf8] sm:$0xf]  ;;  %v4373_v4 = vld [vmem:[#allocation7 + $0x40c] sm:$0xf0] }
 0x12a   :  { %2382 = vmatpush.bf16.msra.mxu0 %v3986_v5  ;;  %2396 = vmatpush.bf16.msra.mxu1 %v4178_v6  ;;  %v3458_v5 = vor.u32 %v4345_v58, %v3455_v59  ;;  %v3650_v6 = vor.u32 %v4393_v60, %v3647_v62  ;;  %v3174_v58 = vor.u32 %v4277_v47, %v3173_v44  ;;  %v3149_v60 = vld [vmem:[#allocation7 + $0xc8] sm:$0xf]  ;;  %v4271_v62 = vld [vmem:[#allocation7 + $0xdc] sm:$0xf0]  ;;  %v3557_v3 = vld [vmem:[#allocation7 + $0x3f8] sm:$0xf] }
 0x12b   :  { %2356 = vmatpush.bf16.msrb.mxu2 %v3554_v8  ;;  %2370 = vmatpush.bf16.msrb.mxu3 %v3746_v7  ;;  %v4339_v8 = vld [vmem:[#allocation7 + $0x304] sm:$0xf]  ;;  %v4289_v7 = vld [vmem:[#allocation7 + $0x16c] sm:$0xf0]  ;;  %v3677_v44 = vld [vmem:[#allocation7 + $0x4e8] sm:$0xf] }
 0x12c   :  { %v3434_v22 = vor.u32 %v4339_v8, %v3431_v9  ;;  %v3150_v8 = vor.u32 %v4271_v62, %v3149_v60  ;;  %v3461_v60 = vld [vmem:[#allocation7 + $0x338] sm:$0xf]  ;;  %v4349_v62 = vld [vmem:[#allocation7 + $0x34c] sm:$0xf0] }
 0x12e   :  { %2383 = vmatpush.bf16.msra.mxu0 %v3962_v20  ;;  %2397 = vmatpush.bf16.msra.mxu1 %v4154_v21  ;;  %v4489_v20 = vld [vmem:[#allocation7 + $0x7b4] sm:$0xf]  ;;  %v4031_v21 = vld [vmem:[#allocation7 + $0x7c8] sm:$0xf0] }
 0x12f   :  { %2357 = vmatpush.bf16.msrb.mxu2 %v3530_v23  ;;  %2371 = vmatpush.bf16.msrb.mxu3 %v3722_v24  ;;  %v477_v35 = vpop.f32.mrf.mxu0  ;;  %v491_v36 = vpop.f32.mrf.mxu1  ;;  %v4034_v30 = vor.u32 %v4489_v20, %v4031_v21 }
 0x130   :  { %v4838_v40 = vpack.c.bf16 %v477_v35, %v475_v13  ;;  %v4840_v41 = vpack.c.bf16 %v491_v36, %v489_v61  ;;  %v3623_v13 = vld [vmem:[#allocation7 + $0x498] sm:$0xf0]  ;;  %v3221_v61 = vld [vmem:[#allocation7 + $0x158] sm:$0xf] }
 0x131   :  { %v3626_v23 = vor.u32 %v4387_v10, %v3623_v13  ;;  %v3222_v24 = vor.u32 %v4289_v7, %v3221_v61  ;;  %v4007_v35 = vld [vmem:[#allocation7 + $0x798] sm:$0xf0]  ;;  %v3605_v36 = vld [vmem:[#allocation7 + $0x458] sm:$0xf]  ;;  %v4265_v13 = vld [vmem:[#allocation7 + $0xac] sm:$0xf0] }
 0x132   :  { %2384 = vmatpush.bf16.msra.mxu0 %v3938_v32  ;;  %2398 = vmatpush.bf16.msra.mxu1 %v4130_v33  ;;  %v4435_v32 = vld [vmem:[#allocation7 + $0x604] sm:$0xf]  ;;  %v3815_v33 = vld [vmem:[#allocation7 + $0x618] sm:$0xf0]  ;;  %v4010_v46 = vor.u32 %v4483_v34, %v4007_v35  ;;  %v3606_v50 = vor.u32 %v4385_v37, %v3605_v36  ;;  %v3125_v10 = vld [vmem:[#allocation7 + $0x98] sm:$0xf] }
 0x133   :  { %2306 = vmatmul.bf16.vlgmr.msra.gmra.mxu2 %v4838_v40  ;;  %2320 = vmatmul.bf16.vlgmr.msra.gmra.mxu3 %v4840_v41  ;;  %v3818_v45 = vor.u32 %v4435_v32, %v3815_v33  ;;  %v3317_v61 = vld [vmem:[#allocation7 + $0x218] sm:$0xf]  ;;  %v4313_v7 = vld [vmem:[#allocation7 + $0x22c] sm:$0xf0]  ;;  %v3126_v20 = vor.u32 %v4265_v13, %v3125_v10  ;;  %v4523_v13 = vld [vmem:[#allocation7 + $0x8bc] sm:$0xf0] }
 0x134   :  { %2358 = vmatpush.bf16.msrb.mxu2 %v3506_v42  ;;  %2372 = vmatpush.bf16.msrb.mxu3 %v3698_v43  ;;  %v3198_v42 = vor.u32 %v4283_v27, %v3197_v26  ;;  %v3390_v43 = vor.u32 %v4331_v31, %v3389_v28  ;;  %v3318_v21 = vor.u32 %v4313_v7, %v3317_v61  ;;  %v3509_v28 = vld [vmem:[#allocation7 + $0x398] sm:$0xf]  ;;  %v4409_v31 = vld [vmem:[#allocation7 + $0x52c] sm:$0xf0]  ;;  %v3437_v61 = vld [vmem:[#allocation7 + $0x308] sm:$0xf] }
 0x135   :  { %v3534_v26 = vor.u32 %v4367_v17, %v3533_v16  ;;  %v3726_v27 = vor.u32 %v4415_v19, %v3725_v18  ;;  %v3077_v34 = vld [vmem:[#allocation7 + $0x38] sm:$0xf]  ;;  %v4253_v35 = vld [vmem:[#allocation7 + $0x4c] sm:$0xf0]  ;;  %v4343_v7 = vld [vmem:[#allocation7 + $0x31c] sm:$0xf0] }
 0x136   :  { %2385 = vmatpush.bf16.msra.mxu0 %v3914_v48  ;;  %2399 = vmatpush.bf16.msra.mxu1 %v4106_v49  ;;  %v3365_v48 = vld [vmem:[#allocation7 + $0x278] sm:$0xf]  ;;  %v4325_v49 = vld [vmem:[#allocation7 + $0x28c] sm:$0xf0]  ;;  %v4286_v16 = vld [vmem:[#allocation7 + $0x15c] sm:$0xf] }
 0x137   :  { %v3366_v59 = vor.u32 %v4325_v49, %v3365_v48  ;;  %v3269_v36 = vld [vmem:[#allocation7 + $0x1b8] sm:$0xf]  ;;  %v4301_v37 = vld [vmem:[#allocation7 + $0x1cc] sm:$0xf0]  ;;  %v3053_v48 = vld [vmem:[#allocation7 + $0x8] sm:$0xf] }
 0x138   :  { %2359 = vmatpush.bf16.msrb.mxu2 %v3482_v56  ;;  %2373 = vmatpush.bf16.msrb.mxu3 %v3674_v57  ;;  %v3773_v56 = vld [vmem:[#allocation7 + $0x5a8] sm:$0xf]  ;;  %v4427_v57 = vld [vmem:[#allocation7 + $0x5bc] sm:$0xf0]  ;;  %v3270_v47 = vor.u32 %v4301_v37, %v3269_v36  ;;  %v3223_v17 = vld [vmem:[#allocation7 + $0x170] sm:$0xf0] }
 0x139   :  { %2334 = vmatmul.bf16.vlgmr.msrb.gmra.mxu0 %v4826_v51  ;;  %2348 = vmatmul.bf16.vlgmr.msrb.gmra.mxu1 %v4828_v52  ;;  %v3774_v2 = vor.u32 %v4427_v57, %v3773_v56  ;;  %v4247_v49 = vld [vmem:[#allocation7 + $0x1c] sm:$0xf0]  ;;  %v4334_v18 = vld [vmem:[#allocation7 + $0x2dc] sm:$0xf]  ;;  %v3415_v19 = vld [vmem:[#allocation7 + $0x2f0] sm:$0xf0] }
 0x13a   :  { %2386 = vmatpush.bf16.msra.mxu0 %v3890_v63  ;;  %2400 = vmatpush.bf16.msra.mxu1 %v4082_v0  ;;  %v3341_v63 = vld [vmem:[#allocation7 + $0x248] sm:$0xf]  ;;  %v4319_v0 = vld [vmem:[#allocation7 + $0x25c] sm:$0xf0] }
 0x13b   :  { %v3342_v9 = vor.u32 %v4319_v0, %v3341_v63  ;;  %v3653_v63 = vld [vmem:[#allocation7 + $0x4b8] sm:$0xf]  ;;  %v4397_v0 = vld [vmem:[#allocation7 + $0x4cc] sm:$0xf0]  ;;  %v3917_v36 = vld [vmem:[#allocation7 + $0x6c8] sm:$0xf] }
 0x13c   :  { %2360 = vmatpush.bf16.msrb.mxu2 %v3458_v5  ;;  %2374 = vmatpush.bf16.msrb.mxu3 %v3650_v6  ;;  %v3749_v5 = vld [vmem:[#allocation7 + $0x578] sm:$0xf]  ;;  %v4421_v6 = vld [vmem:[#allocation7 + $0x58c] sm:$0xf0]  ;;  %v3654_v10 = vor.u32 %v4397_v0, %v3653_v63  ;;  %v4463_v37 = vld [vmem:[#allocation7 + $0x6dc] sm:$0xf0] }
 0x13e   :  { %2387 = vmatpush.bf16.msra.mxu0 %v3866_v14  ;;  %2401 = vmatpush.bf16.msra.mxu1 %v4058_v15  ;;  %v3558_v14 = vor.u32 %v4373_v4, %v3557_v3  ;;  %v3750_v15 = vor.u32 %v4421_v6, %v3749_v5  ;;  %v3990_v3 = vor.u32 %v4481_v55, %v3989_v54  ;;  %v3965_v5 = vld [vmem:[#allocation7 + $0x728] sm:$0xf]  ;;  %v4475_v6 = vld [vmem:[#allocation7 + $0x73c] sm:$0xf0] }
 0x140   :  { %2361 = vmatpush.bf16.msrb.mxu2 %v3434_v22  ;;  %2375 = vmatpush.bf16.msrb.mxu3 %v3626_v23  ;;  %v3101_v22 = vld [vmem:[#allocation7 + $0x68] sm:$0xf]  ;;  %v4259_v23 = vld [vmem:[#allocation7 + $0x7c] sm:$0xf0] }
 0x141   :  { %v3102_v32 = vor.u32 %v4259_v23, %v3101_v22  ;;  %v3438_v22 = vor.u32 %v4343_v7, %v3437_v61 }
 0x142   :  { %2388 = vmatpush.bf16.msra.mxu0 %v3842_v29  ;;  %2402 = vmatpush.bf16.msra.mxu1 %v4034_v30  ;;  %v4361_v29 = vld [vmem:[#allocation7 + $0x3ac] sm:$0xf0]  ;;  %v3701_v30 = vld [vmem:[#allocation7 + $0x518] sm:$0xf] }
 0x143   :  { %2362 = vmatmul.bf16.vlgmr.msrb.gmra.mxu2 %v4832_v11  ;;  %2376 = vmatmul.bf16.vlgmr.msrb.gmra.mxu3 %v4834_v12  ;;  %v3510_v38 = vor.u32 %v4361_v29, %v3509_v28  ;;  %v3702_v39 = vor.u32 %v4409_v31, %v3701_v30  ;;  %v4133_v28 = vld [vmem:[#allocation7 + $0x878] sm:$0xf]  ;;  %v4517_v29 = vld [vmem:[#allocation7 + $0x88c] sm:$0xf0]  ;;  %v4280_v30 = vld [vmem:[#allocation7 + $0x12c] sm:$0xf] }
 0x144   :  { %2410 = vmatpush.bf16.msra.mxu2 %v3222_v24  ;;  %2424 = vmatpush.bf16.msra.mxu3 %v3414_v25  ;;  %v3293_v24 = vld [vmem:[#allocation7 + $0x1e8] sm:$0xf]  ;;  %v4307_v25 = vld [vmem:[#allocation7 + $0x1fc] sm:$0xf0]  ;;  %v3199_v31 = vld [vmem:[#allocation7 + $0x140] sm:$0xf0] }
 0x145   :  { %v3294_v33 = vor.u32 %v4307_v25, %v3293_v24  ;;  %v3941_v24 = vld [vmem:[#allocation7 + $0x6f8] sm:$0xf]  ;;  %v4469_v25 = vld [vmem:[#allocation7 + $0x70c] sm:$0xf0] }
 0x146   :  { %2389 = vmatpush.bf16.msra.mxu0 %v3818_v45  ;;  %2403 = vmatpush.bf16.msra.mxu1 %v4010_v46  ;;  %v4403_v45 = vld [vmem:[#allocation7 + $0x4fc] sm:$0xf0]  ;;  %v3078_v46 = vor.u32 %v4253_v35, %v3077_v34  ;;  %v3942_v34 = vor.u32 %v4469_v25, %v3941_v24  ;;  %v4134_v35 = vor.u32 %v4517_v29, %v4133_v28  ;;  %v4013_v28 = vld [vmem:[#allocation7 + $0x788] sm:$0xf] }
 0x147   :  { %v3678_v57 = vor.u32 %v4403_v45, %v3677_v44  ;;  %v4274_v44 = vld [vmem:[#allocation7 + $0xfc] sm:$0xf]  ;;  %v3175_v45 = vld [vmem:[#allocation7 + $0x110] sm:$0xf0] }
 0x148   :  { %2411 = vmatpush.bf16.msra.mxu2 %v3198_v42  ;;  %2425 = vmatpush.bf16.msra.mxu3 %v3390_v43  ;;  %v3485_v42 = vld [vmem:[#allocation7 + $0x368] sm:$0xf]  ;;  %v4355_v43 = vld [vmem:[#allocation7 + $0x37c] sm:$0xf0]  ;;  %v3178_v54 = vor.u32 %v4274_v44, %v3175_v45 }
 0x149   :  { %2390 = vmatmul.bf16.vlgmr.msra.gmra.mxu0 %v4838_v40  ;;  %2404 = vmatmul.bf16.vlgmr.msra.gmra.mxu1 %v4840_v41  ;;  %v3486_v56 = vor.u32 %v4355_v43, %v3485_v42  ;;  %v4109_v42 = vld [vmem:[#allocation7 + $0x848] sm:$0xf]  ;;  %v4511_v43 = vld [vmem:[#allocation7 + $0x85c] sm:$0xf0] }
 0x14a   :  { %2438 = vmatpush.bf16.msrb.mxu0 %v3606_v50  ;;  %2452 = vmatpush.bf16.msrb.mxu1 %v3798_v53  ;;  %v3245_v50 = vld [vmem:[#allocation7 + $0x188] sm:$0xf]  ;;  %v4295_v53 = vld [vmem:[#allocation7 + $0x19c] sm:$0xf0] }
 0x14c   :  { %2412 = vmatpush.bf16.msra.mxu2 %v3174_v58  ;;  %2426 = vmatpush.bf16.msra.mxu3 %v3366_v59  ;;  %v4181_v58 = vld [vmem:[#allocation7 + $0x8d8] sm:$0xf]  ;;  %v4529_v59 = vld [vmem:[#allocation7 + $0x8ec] sm:$0xf0] }
 0x14d   :  { %v4182_v4 = vor.u32 %v4529_v59, %v4181_v58  ;;  %v4268_v58 = vld [vmem:[#allocation7 + $0xcc] sm:$0xf]  ;;  %v3151_v59 = vld [vmem:[#allocation7 + $0xe0] sm:$0xf0] }
 0x14e   :  { %2439 = vmatpush.bf16.msrb.mxu0 %v3582_v1  ;;  %2453 = vmatpush.bf16.msrb.mxu1 %v3774_v2  ;;  %v3054_v1 = vor.u32 %v4247_v49, %v3053_v48  ;;  %v3246_v2 = vor.u32 %v4295_v53, %v3245_v50  ;;  %v3918_v48 = vor.u32 %v4463_v37, %v3917_v36  ;;  %v3893_v50 = vld [vmem:[#allocation7 + $0x698] sm:$0xf]  ;;  %v4457_v53 = vld [vmem:[#allocation7 + $0x6ac] sm:$0xf0]  ;;  %v4250_v36 = vld [vmem:[#allocation7 + $0x3c] sm:$0xf] }
 0x14f   :  { %v4110_v49 = vor.u32 %v4511_v43, %v4109_v42  ;;  %v3894_v63 = vor.u32 %v4457_v53, %v3893_v50  ;;  %v3079_v37 = vld [vmem:[#allocation7 + $0x50] sm:$0xf0]  ;;  %v3775_v53 = vld [vmem:[#allocation7 + $0x5c0] sm:$0xf0] }
 0x150   :  { %2413 = vmatpush.bf16.msra.mxu2 %v3150_v8  ;;  %2427 = vmatpush.bf16.msra.mxu3 %v3342_v9  ;;  %v4157_v8 = vld [vmem:[#allocation7 + $0x8a8] sm:$0xf]  ;;  %v3462_v9 = vor.u32 %v4349_v62, %v3461_v60  ;;  %v4316_v60 = vld [vmem:[#allocation7 + $0x24c] sm:$0xf]  ;;  %v3343_v62 = vld [vmem:[#allocation7 + $0x260] sm:$0xf0] }
 0x152   :  { %2440 = vmatpush.bf16.msrb.mxu0 %v3558_v14  ;;  %2454 = vmatpush.bf16.msrb.mxu1 %v3750_v15  ;;  %v3629_v14 = vld [vmem:[#allocation7 + $0x488] sm:$0xf]  ;;  %v4391_v15 = vld [vmem:[#allocation7 + $0x49c] sm:$0xf0] }
 0x153   :  { %v3630_v23 = vor.u32 %v4391_v15, %v3629_v14  ;;  %v3845_v14 = vld [vmem:[#allocation7 + $0x638] sm:$0xf]  ;;  %v4445_v15 = vld [vmem:[#allocation7 + $0x64c] sm:$0xf0] }
 0x154   :  { %2414 = vmatpush.bf16.msra.mxu2 %v3126_v20  ;;  %2428 = vmatpush.bf16.msra.mxu3 %v3318_v21  ;;  %v3966_v20 = vor.u32 %v4475_v6, %v3965_v5  ;;  %v4158_v21 = vor.u32 %v4523_v13, %v4157_v8  ;;  %v4061_v5 = vld [vmem:[#allocation7 + $0x7e8] sm:$0xf]  ;;  %v4499_v6 = vld [vmem:[#allocation7 + $0x7fc] sm:$0xf0]  ;;  %v4262_v8 = vld [vmem:[#allocation7 + $0x9c] sm:$0xf]  ;;  %v3846_v24 = vor.u32 %v4445_v15, %v3845_v14 }
 0x155   :  { %v3319_v13 = vld [vmem:[#allocation7 + $0x230] sm:$0xf0]  ;;  %v4062_v7 = vor.u32 %v4499_v6, %v4061_v5 }
 0x156   :  { %2441 = vmatpush.bf16.msrb.mxu0 %v3534_v26  ;;  %2455 = vmatpush.bf16.msrb.mxu1 %v3726_v27  ;;  %v3226_v26 = vor.u32 %v4286_v16, %v3223_v17  ;;  %v3418_v27 = vor.u32 %v4334_v18, %v3415_v19  ;;  %v4037_v18 = vld [vmem:[#allocation7 + $0x7b8] sm:$0xf]  ;;  %v4493_v19 = vld [vmem:[#allocation7 + $0x7cc] sm:$0xf0] }
 0x157   :  { %v4038_v25 = vor.u32 %v4493_v19, %v4037_v18 }
 0x158   :  { %2415 = vmatpush.bf16.msra.mxu2 %v3102_v32  ;;  %2429 = vmatpush.bf16.msra.mxu3 %v3294_v33  ;;  %v4328_v32 = vld [vmem:[#allocation7 + $0x2ac] sm:$0xf]  ;;  %v3391_v33 = vld [vmem:[#allocation7 + $0x2c0] sm:$0xf0] }
 0x15a   :  { %2442 = vmatpush.bf16.msrb.mxu0 %v3510_v38  ;;  %2456 = vmatpush.bf16.msrb.mxu1 %v3702_v39  ;;  %v3202_v38 = vor.u32 %v4280_v30, %v3199_v31  ;;  %v3394_v39 = vor.u32 %v4328_v32, %v3391_v33  ;;  %v4487_v31 = vld [vmem:[#allocation7 + $0x79c] sm:$0xf0]  ;;  %v4382_v32 = vld [vmem:[#allocation7 + $0x45c] sm:$0xf]  ;;  %v3607_v33 = vld [vmem:[#allocation7 + $0x470] sm:$0xf0] }
 0x15b   :  { %v4014_v43 = vor.u32 %v4487_v31, %v4013_v28  ;;  %v3610_v44 = vor.u32 %v4382_v32, %v3607_v33  ;;  %v4358_v28 = vld [vmem:[#allocation7 + $0x39c] sm:$0xf]  ;;  %v3703_v33 = vld [vmem:[#allocation7 + $0x530] sm:$0xf0] }
 0x15c   :  { %2416 = vmatpush.bf16.msra.mxu2 %v3078_v46  ;;  %2430 = vmatpush.bf16.msra.mxu3 %v3270_v47  ;;  %v4322_v46 = vld [vmem:[#allocation7 + $0x27c] sm:$0xf]  ;;  %v3367_v47 = vld [vmem:[#allocation7 + $0x290] sm:$0xf0] }
 0x15d   :  { %v3370_v55 = vor.u32 %v4322_v46, %v3367_v47  ;;  %v4376_v46 = vld [vmem:[#allocation7 + $0x42c] sm:$0xf]  ;;  %v3583_v47 = vld [vmem:[#allocation7 + $0x440] sm:$0xf0]  ;;  %v4406_v32 = vld [vmem:[#allocation7 + $0x51c] sm:$0xf] }
 0x15e   :  { %2443 = vmatpush.bf16.msrb.mxu0 %v3486_v56  ;;  %2457 = vmatpush.bf16.msrb.mxu1 %v3678_v57  ;;  %v4085_v56 = vld [vmem:[#allocation7 + $0x818] sm:$0xf]  ;;  %v4505_v57 = vld [vmem:[#allocation7 + $0x82c] sm:$0xf0] }
 0x15f   :  { %v4086_v0 = vor.u32 %v4505_v57, %v4085_v56  ;;  %v4292_v56 = vld [vmem:[#allocation7 + $0x18c] sm:$0xf]  ;;  %v3247_v57 = vld [vmem:[#allocation7 + $0x1a0] sm:$0xf0] }
 0x160   :  { %2417 = vmatpush.bf16.msra.mxu2 %v3054_v1  ;;  %2431 = vmatpush.bf16.msra.mxu3 %v3246_v2  ;;  %v3869_v1 = vld [vmem:[#allocation7 + $0x668] sm:$0xf]  ;;  %v4451_v2 = vld [vmem:[#allocation7 + $0x67c] sm:$0xf0] }
 0x161   :  { %v3870_v61 = vor.u32 %v4451_v2, %v3869_v1  ;;  %v3250_v2 = vor.u32 %v4292_v56, %v3247_v57  ;;  %v4346_v56 = vld [vmem:[#allocation7 + $0x33c] sm:$0xf]  ;;  %v3463_v57 = vld [vmem:[#allocation7 + $0x350] sm:$0xf0] }
 0x162   :  { %2444 = vmatpush.bf16.msrb.mxu0 %v3462_v9  ;;  %2458 = vmatpush.bf16.msrb.mxu1 %v3654_v10  ;;  %v3127_v9 = vld [vmem:[#allocation7 + $0xb0] sm:$0xf0]  ;;  %v4310_v10 = vld [vmem:[#allocation7 + $0x21c] sm:$0xf] }
 0x163   :  { %2418 = vmatmul.bf16.vlgmr.msra.gmra.mxu2 %v4826_v51  ;;  %2432 = vmatmul.bf16.vlgmr.msra.gmra.mxu3 %v4828_v52  ;;  %v3130_v16 = vor.u32 %v4262_v8, %v3127_v9  ;;  %v3322_v17 = vor.u32 %v4310_v10, %v3319_v13  ;;  %v4418_v8 = vld [vmem:[#allocation7 + $0x57c] sm:$0xf]  ;;  %v3751_v9 = vld [vmem:[#allocation7 + $0x590] sm:$0xf0]  ;;  %v4472_v10 = vld [vmem:[#allocation7 + $0x72c] sm:$0xf] }
 0x164   :  { %2466 = vmatpush.bf16.msrb.mxu2 %v3990_v3  ;;  %2480 = vmatpush.bf16.msrb.mxu3 %v4182_v4  ;;  %v3154_v3 = vor.u32 %v4268_v58, %v3151_v59  ;;  %v3346_v4 = vor.u32 %v4316_v60, %v3343_v62  ;;  %v4478_v58 = vld [vmem:[#allocation7 + $0x75c] sm:$0xf]  ;;  %v3991_v59 = vld [vmem:[#allocation7 + $0x770] sm:$0xf0]  ;;  %v3967_v13 = vld [vmem:[#allocation7 + $0x740] sm:$0xf0]  ;;  %v3754_v15 = vor.u32 %v4418_v8, %v3751_v9 }
 0x165   :  { %v4526_v60 = vld [vmem:[#allocation7 + $0x8dc] sm:$0xf]  ;;  %v4183_v62 = vld [vmem:[#allocation7 + $0x8f0] sm:$0xf0]  ;;  %v3994_v5 = vor.u32 %v4478_v58, %v3991_v59  ;;  %v3970_v18 = vor.u32 %v4472_v10, %v3967_v13  ;;  %v4388_v8 = vld [vmem:[#allocation7 + $0x48c] sm:$0xf] }
 0x166   :  { %2445 = vmatpush.bf16.msrb.mxu0 %v3438_v22  ;;  %2459 = vmatpush.bf16.msrb.mxu1 %v3630_v23  ;;  %v4304_v22 = vld [vmem:[#allocation7 + $0x1ec] sm:$0xf]  ;;  %v3295_v23 = vld [vmem:[#allocation7 + $0x200] sm:$0xf0]  ;;  %v4186_v6 = vor.u32 %v4526_v60, %v4183_v62  ;;  %v4394_v60 = vld [vmem:[#allocation7 + $0x4bc] sm:$0xf] }
 0x167   :  { %v3298_v30 = vor.u32 %v4304_v22, %v3295_v23  ;;  %v4466_v22 = vld [vmem:[#allocation7 + $0x6fc] sm:$0xf]  ;;  %v3943_v23 = vld [vmem:[#allocation7 + $0x710] sm:$0xf0]  ;;  %v3631_v13 = vld [vmem:[#allocation7 + $0x4a0] sm:$0xf0] }
 0x168   :  { %2467 = vmatpush.bf16.msrb.mxu2 %v3966_v20  ;;  %2481 = vmatpush.bf16.msrb.mxu3 %v4158_v21  ;;  %v4256_v20 = vld [vmem:[#allocation7 + $0x6c] sm:$0xf]  ;;  %v3103_v21 = vld [vmem:[#allocation7 + $0x80] sm:$0xf0]  ;;  %v3655_v62 = vld [vmem:[#allocation7 + $0x4d0] sm:$0xf0] }
 0x169   :  { %2446 = vmatmul.bf16.vlgmr.msrb.gmra.mxu0 %v4832_v11  ;;  %2460 = vmatmul.bf16.vlgmr.msrb.gmra.mxu1 %v4834_v12  ;;  %v3106_v29 = vor.u32 %v4256_v20, %v3103_v21  ;;  %v4412_v20 = vld [vmem:[#allocation7 + $0x54c] sm:$0xf]  ;;  %v3727_v21 = vld [vmem:[#allocation7 + $0x560] sm:$0xf0] }
 0x16a   :  { %2494 = vmatpush.bf16.msra.mxu0 %v3226_v26  ;;  %2508 = vmatpush.bf16.msra.mxu1 %v3418_v27  ;;  %v3821_v26 = vld [vmem:[#allocation7 + $0x608] sm:$0xf]  ;;  %v4439_v27 = vld [vmem:[#allocation7 + $0x61c] sm:$0xf0] }
 0x16b   :  { %v3822_v42 = vor.u32 %v4439_v27, %v3821_v26  ;;  %v3730_v27 = vor.u32 %v4412_v20, %v3727_v21  ;;  %v3634_v21 = vor.u32 %v4388_v8, %v3631_v13  ;;  %v4266_v13 = vld [vmem:[#allocation7 + $0xb4] sm:$0xf0] }
 0x16c   :  { %2468 = vmatpush.bf16.msrb.mxu2 %v3942_v34  ;;  %2482 = vmatpush.bf16.msrb.mxu3 %v4134_v35  ;;  %v4430_v34 = vld [vmem:[#allocation7 + $0x5dc] sm:$0xf]  ;;  %v3799_v35 = vld [vmem:[#allocation7 + $0x5f0] sm:$0xf0] }
 0x16d   :  { %v3802_v45 = vor.u32 %v4430_v34, %v3799_v35  ;;  %v4460_v34 = vld [vmem:[#allocation7 + $0x6cc] sm:$0xf]  ;;  %v3919_v35 = vld [vmem:[#allocation7 + $0x6e0] sm:$0xf0] }
 0x16e   :  { %2495 = vmatpush.bf16.msra.mxu0 %v3202_v38  ;;  %2509 = vmatpush.bf16.msra.mxu1 %v3394_v39  ;;  %v4298_v38 = vld [vmem:[#allocation7 + $0x1bc] sm:$0xf]  ;;  %v3271_v39 = vld [vmem:[#allocation7 + $0x1d0] sm:$0xf0] }
 0x16f   :  { %v3274_v50 = vor.u32 %v4298_v38, %v3271_v39  ;;  %v3706_v39 = vor.u32 %v4406_v32, %v3703_v33  ;;  %v4484_v32 = vld [vmem:[#allocation7 + $0x78c] sm:$0xf]  ;;  %v4015_v33 = vld [vmem:[#allocation7 + $0x7a0] sm:$0xf0] }
 0x170   :  { %2469 = vmatpush.bf16.msrb.mxu2 %v3918_v48  ;;  %2483 = vmatpush.bf16.msrb.mxu3 %v4110_v49  ;;  %v4424_v48 = vld [vmem:[#allocation7 + $0x5ac] sm:$0xf]  ;;  %v3082_v49 = vor.u32 %v4250_v36, %v3079_v37  ;;  %v4111_v37 = vld [vmem:[#allocation7 + $0x860] sm:$0xf0] }
 0x171   :  { %v4508_v36 = vld [vmem:[#allocation7 + $0x84c] sm:$0xf] }
 0x172   :  { %2496 = vmatpush.bf16.msra.mxu0 %v3178_v54  ;;  %2510 = vmatpush.bf16.msra.mxu1 %v3370_v55  ;;  %v4244_v54 = vld [vmem:[#allocation7 + $0xc] sm:$0xf]  ;;  %v3055_v55 = vld [vmem:[#allocation7 + $0x20] sm:$0xf0] }
 0x173   :  { %v3058_v1 = vor.u32 %v4244_v54, %v3055_v55 }
 0x174   :  { %2470 = vmatpush.bf16.msrb.mxu2 %v3894_v63  ;;  %2484 = vmatpush.bf16.msrb.mxu3 %v4086_v0  ;;  %v3586_v63 = vor.u32 %v4376_v46, %v3583_v47  ;;  %v3778_v0 = vor.u32 %v4424_v48, %v3775_v53  ;;  %v4400_v46 = vld [vmem:[#allocation7 + $0x4ec] sm:$0xf]  ;;  %v3679_v47 = vld [vmem:[#allocation7 + $0x500] sm:$0xf0]  ;;  %v4454_v48 = vld [vmem:[#allocation7 + $0x69c] sm:$0xf] }
 0x175   :  { %v4087_v53 = vld [vmem:[#allocation7 + $0x830] sm:$0xf0]  ;;  %v3682_v55 = vor.u32 %v4400_v46, %v3679_v47 }
 0x176   :  { %2497 = vmatpush.bf16.msra.mxu0 %v3154_v3  ;;  %2511 = vmatpush.bf16.msra.mxu1 %v3346_v4  ;;  %v4370_v3 = vld [vmem:[#allocation7 + $0x3fc] sm:$0xf]  ;;  %v3559_v4 = vld [vmem:[#allocation7 + $0x410] sm:$0xf0] }
 0x177   :  { %v3562_v14 = vor.u32 %v4370_v3, %v3559_v4  ;;  %v3466_v3 = vor.u32 %v4346_v56, %v3463_v57  ;;  %v3658_v4 = vor.u32 %v4394_v60, %v3655_v62  ;;  %v4860_v60 = vld [vmem:[#allocation8] sm:$0x3f] }
 0x178   :  { %2471 = vmatpush.bf16.msrb.mxu2 %v3870_v61  ;;  %2485 = vmatpush.bf16.msrb.mxu3 %v4062_v7  ;;  %v4520_v61 = vld [vmem:[#allocation7 + $0x8ac] sm:$0xf]  ;;  %v4159_v7 = vld [vmem:[#allocation7 + $0x8c0] sm:$0xf0] }
 0x179   :  { %v4162_v19 = vor.u32 %v4520_v61, %v4159_v7  ;;  %v3229_v61 = vld [vmem:[#allocation7 + $0x160] sm:$0xf]  ;;  %v4290_v7 = vld [vmem:[#allocation7 + $0x174] sm:$0xf0] }
 0x17a   :  { %2498 = vmatpush.bf16.msra.mxu0 %v3130_v16  ;;  %2512 = vmatpush.bf16.msra.mxu1 %v3322_v17  ;;  %v4364_v16 = vld [vmem:[#allocation7 + $0x3cc] sm:$0xf]  ;;  %v3535_v17 = vld [vmem:[#allocation7 + $0x3e0] sm:$0xf0] }
 0x17b   :  { %v3538_v26 = vor.u32 %v4364_v16, %v3535_v17  ;;  %v4442_v16 = vld [vmem:[#allocation7 + $0x63c] sm:$0xf]  ;;  %v3847_v17 = vld [vmem:[#allocation7 + $0x650] sm:$0xf0] }
 0x17c   :  { %2472 = vmatpush.bf16.msrb.mxu2 %v3846_v24  ;;  %2486 = vmatpush.bf16.msrb.mxu3 %v4038_v25  ;;  %v4514_v24 = vld [vmem:[#allocation7 + $0x87c] sm:$0xf]  ;;  %v4135_v25 = vld [vmem:[#allocation7 + $0x890] sm:$0xf0] }
 0x17d   :  { %v4138_v31 = vor.u32 %v4514_v24, %v4135_v25  ;;  %v3205_v24 = vld [vmem:[#allocation7 + $0x130] sm:$0xf]  ;;  %v4284_v25 = vld [vmem:[#allocation7 + $0x144] sm:$0xf0] }
 0x17e   :  { %2499 = vmatpush.bf16.msra.mxu0 %v3106_v29  ;;  %2513 = vmatpush.bf16.msra.mxu1 %v3298_v30  ;;  %v3511_v29 = vld [vmem:[#allocation7 + $0x3b0] sm:$0xf0]  ;;  %v3946_v30 = vor.u32 %v4466_v22, %v3943_v23  ;;  %v3230_v22 = vor.u32 %v4290_v7, %v3229_v61 }
 0x17f   :  { %v3514_v38 = vor.u32 %v4358_v28, %v3511_v29  ;;  %v4332_v29 = vld [vmem:[#allocation7 + $0x2c4] sm:$0xf0] }
 0x180   :  { %2473 = vmatpush.bf16.msrb.mxu2 %v3822_v42  ;;  %2487 = vmatpush.bf16.msrb.mxu3 %v4014_v43  ;;  %v4352_v42 = vld [vmem:[#allocation7 + $0x36c] sm:$0xf]  ;;  %v3487_v43 = vld [vmem:[#allocation7 + $0x380] sm:$0xf0] }
 0x181   :  { %v3490_v54 = vor.u32 %v4352_v42, %v3487_v43  ;;  %v4018_v43 = vor.u32 %v4484_v32, %v4015_v33  ;;  %v3301_v32 = vld [vmem:[#allocation7 + $0x1f0] sm:$0xf]  ;;  %v4308_v33 = vld [vmem:[#allocation7 + $0x204] sm:$0xf0] }
 0x182   :  { %2500 = vmatpush.bf16.msra.mxu0 %v3082_v49  ;;  %2514 = vmatpush.bf16.msra.mxu1 %v3274_v50  ;;  %v3895_v49 = vld [vmem:[#allocation7 + $0x6b0] sm:$0xf0]  ;;  %v4502_v50 = vld [vmem:[#allocation7 + $0x81c] sm:$0xf] }
 0x183   :  { %2474 = vmatmul.bf16.vlgmr.msrb.gmra.mxu2 %v4838_v40  ;;  %2488 = vmatmul.bf16.vlgmr.msrb.gmra.mxu3 %v4840_v41  ;;  %v3898_v58 = vor.u32 %v4454_v48, %v3895_v49  ;;  %v4090_v59 = vor.u32 %v4502_v50, %v4087_v53  ;;  %v3373_v48 = vld [vmem:[#allocation7 + $0x280] sm:$0xf]  ;;  %v4326_v49 = vld [vmem:[#allocation7 + $0x294] sm:$0xf0]  ;;  %v3589_v50 = vld [vmem:[#allocation7 + $0x430] sm:$0xf] }
 0x184   :  { %2522 = vmatpush.bf16.msra.mxu2 %v3610_v44  ;;  %2536 = vmatpush.bf16.msra.mxu3 %v3802_v45  ;;  %v3922_v44 = vor.u32 %v4460_v34, %v3919_v35  ;;  %v4114_v45 = vor.u32 %v4508_v36, %v4111_v37  ;;  %v3613_v34 = vld [vmem:[#allocation7 + $0x460] sm:$0xf]  ;;  %v4386_v35 = vld [vmem:[#allocation7 + $0x474] sm:$0xf0]  ;;  %v4380_v53 = vld [vmem:[#allocation7 + $0x444] sm:$0xf0]  ;;  %v3374_v57 = vor.u32 %v4326_v49, %v3373_v48 }
 0x185   :  { %v3805_v36 = vld [vmem:[#allocation7 + $0x5e0] sm:$0xf]  ;;  %v4434_v37 = vld [vmem:[#allocation7 + $0x5f4] sm:$0xf0]  ;;  %v3614_v46 = vor.u32 %v4386_v35, %v3613_v34  ;;  %v3590_v62 = vor.u32 %v4380_v53, %v3589_v50  ;;  %v3493_v50 = vld [vmem:[#allocation7 + $0x370] sm:$0xf] }
 0x186   :  { %2501 = vmatpush.bf16.msra.mxu0 %v3058_v1  ;;  %2515 = vmatpush.bf16.msra.mxu1 %v3250_v2  ;;  %v4496_v1 = vld [vmem:[#allocation7 + $0x7ec] sm:$0xf]  ;;  %v4063_v2 = vld [vmem:[#allocation7 + $0x800] sm:$0xf0]  ;;  %v3806_v47 = vor.u32 %v4434_v37, %v3805_v36  ;;  %v3517_v34 = vld [vmem:[#allocation7 + $0x3a0] sm:$0xf] }
 0x187   :  { %v4066_v10 = vor.u32 %v4496_v1, %v4063_v2  ;;  %v4320_v1 = vld [vmem:[#allocation7 + $0x264] sm:$0xf0]  ;;  %v3565_v2 = vld [vmem:[#allocation7 + $0x400] sm:$0xf]  ;;  %v4362_v35 = vld [vmem:[#allocation7 + $0x3b4] sm:$0xf0] }
 0x188   :  { %2523 = vmatpush.bf16.msra.mxu2 %v3586_v63  ;;  %2537 = vmatpush.bf16.msra.mxu3 %v3778_v0  ;;  %v4448_v63 = vld [vmem:[#allocation7 + $0x66c] sm:$0xf]  ;;  %v3871_v0 = vld [vmem:[#allocation7 + $0x680] sm:$0xf0]  ;;  %v3709_v36 = vld [vmem:[#allocation7 + $0x520] sm:$0xf] }
 0x189   :  { %2502 = vmatmul.bf16.vlgmr.msra.gmra.mxu0 %v4826_v51  ;;  %2516 = vmatmul.bf16.vlgmr.msra.gmra.mxu1 %v4828_v52  ;;  %v3874_v9 = vor.u32 %v4448_v63, %v3871_v0  ;;  %v3349_v0 = vld [vmem:[#allocation7 + $0x250] sm:$0xf]  ;;  %v4410_v37 = vld [vmem:[#allocation7 + $0x534] sm:$0xf0]  ;;  %v3277_v48 = vld [vmem:[#allocation7 + $0x1c0] sm:$0xf] }
 0x18a   :  { %2550 = vmatpush.bf16.msrb.mxu0 %v3994_v5  ;;  %2564 = vmatpush.bf16.msrb.mxu1 %v4186_v6  ;;  %v4340_v5 = vld [vmem:[#allocation7 + $0x30c] sm:$0xf]  ;;  %v3439_v6 = vld [vmem:[#allocation7 + $0x320] sm:$0xf0]  ;;  %v4302_v49 = vld [vmem:[#allocation7 + $0x1d4] sm:$0xf0] }
 0x18b   :  { %v3442_v20 = vor.u32 %v4340_v5, %v3439_v6  ;;  %v4422_v5 = vld [vmem:[#allocation7 + $0x594] sm:$0xf0]  ;;  %v790_v6 = vperm.slane %v4860_v60, 0 }
 0x18c   :  { %2524 = vmatpush.bf16.msra.mxu2 %v3562_v14  ;;  %2538 = vmatpush.bf16.msra.mxu3 %v3754_v15  ;;  %v3421_v14 = vld [vmem:[#allocation7 + $0x2e0] sm:$0xf]  ;;  %v4338_v15 = vld [vmem:[#allocation7 + $0x2f4] sm:$0xf0] }
 0x18d   :  { %v3422_v23 = vor.u32 %v4338_v15, %v3421_v14  ;;  %v3325_v14 = vld [vmem:[#allocation7 + $0x220] sm:$0xf]  ;;  %v4314_v15 = vld [vmem:[#allocation7 + $0x234] sm:$0xf0] }
 0x18e   :  { %2551 = vmatpush.bf16.msrb.mxu0 %v3970_v18  ;;  %2565 = vmatpush.bf16.msrb.mxu1 %v4162_v19  ;;  %v4490_v18 = vld [vmem:[#allocation7 + $0x7bc] sm:$0xf]  ;;  %v4039_v19 = vld [vmem:[#allocation7 + $0x7d0] sm:$0xf0] }
 0x18f   :  { %v4042_v28 = vor.u32 %v4490_v18, %v4039_v19  ;;  %v4368_v19 = vld [vmem:[#allocation7 + $0x3e4] sm:$0xf0] }
 0x190   :  { %2525 = vmatpush.bf16.msra.mxu2 %v3538_v26  ;;  %2539 = vmatpush.bf16.msra.mxu3 %v3730_v27  ;;  %v3397_v26 = vld [vmem:[#allocation7 + $0x2b0] sm:$0xf]  ;;  %v3850_v27 = vor.u32 %v4442_v16, %v3847_v17 }
 0x191   :  { %v3541_v16 = vld [vmem:[#allocation7 + $0x3d0] sm:$0xf] }
 0x192   :  { %2552 = vmatpush.bf16.msrb.mxu0 %v3946_v30  ;;  %2566 = vmatpush.bf16.msrb.mxu1 %v4138_v31  ;;  %v4436_v30 = vld [vmem:[#allocation7 + $0x60c] sm:$0xf]  ;;  %v3823_v31 = vld [vmem:[#allocation7 + $0x620] sm:$0xf0] }
 0x193   :  { %v3826_v42 = vor.u32 %v4436_v30, %v3823_v31  ;;  %v3542_v30 = vor.u32 %v4368_v19, %v3541_v16  ;;  %v3661_v16 = vld [vmem:[#allocation7 + $0x4c0] sm:$0xf] }
 0x194   :  { %2526 = vmatpush.bf16.msra.mxu2 %v3514_v38  ;;  %2540 = vmatpush.bf16.msra.mxu3 %v3706_v39  ;;  %v3206_v38 = vor.u32 %v4284_v25, %v3205_v24  ;;  %v3398_v39 = vor.u32 %v4332_v29, %v3397_v26  ;;  %v3326_v26 = vor.u32 %v4314_v15, %v3325_v14  ;;  %v4350_v15 = vld [vmem:[#allocation7 + $0x354] sm:$0xf0] }
 0x196   :  { %2553 = vmatpush.bf16.msrb.mxu0 %v3922_v44  ;;  %2567 = vmatpush.bf16.msrb.mxu1 %v4114_v45  ;;  %v3181_v44 = vld [vmem:[#allocation7 + $0x100] sm:$0xf]  ;;  %v4278_v45 = vld [vmem:[#allocation7 + $0x114] sm:$0xf0] }
 0x197   :  { %v3182_v56 = vor.u32 %v4278_v45, %v3181_v44  ;;  %v4254_v44 = vld [vmem:[#allocation7 + $0x54] sm:$0xf0] }
 0x198   :  { %2527 = vmatpush.bf16.msra.mxu2 %v3490_v54  ;;  %2541 = vmatpush.bf16.msra.mxu3 %v3682_v55  ;;  %v3781_v54 = vld [vmem:[#allocation7 + $0x5b0] sm:$0xf]  ;;  %v4428_v55 = vld [vmem:[#allocation7 + $0x5c4] sm:$0xf0] }
 0x199   :  { %v3782_v63 = vor.u32 %v4428_v55, %v3781_v54  ;;  %v4356_v55 = vld [vmem:[#allocation7 + $0x384] sm:$0xf0] }
 0x19a   :  { %2554 = vmatpush.bf16.msrb.mxu0 %v3898_v58  ;;  %2568 = vmatpush.bf16.msrb.mxu1 %v4090_v59  ;;  %v3157_v58 = vld [vmem:[#allocation7 + $0xd0] sm:$0xf]  ;;  %v4272_v59 = vld [vmem:[#allocation7 + $0xe4] sm:$0xf0] }
 0x19b   :  { %v3158_v8 = vor.u32 %v4272_v59, %v3157_v58 }
 0x19c   :  { %2528 = vmatpush.bf16.msra.mxu2 %v3466_v3  ;;  %2542 = vmatpush.bf16.msra.mxu3 %v3658_v4  ;;  %v4374_v3 = vld [vmem:[#allocation7 + $0x414] sm:$0xf0]  ;;  %v3757_v4 = vld [vmem:[#allocation7 + $0x580] sm:$0xf] }
 0x19d   :  { %v3566_v61 = vor.u32 %v4374_v3, %v3565_v2  ;;  %v3758_v7 = vor.u32 %v4422_v5, %v3757_v4  ;;  %v4248_v2 = vld [vmem:[#allocation7 + $0x24] sm:$0xf0]  ;;  %v3253_v3 = vld [vmem:[#allocation7 + $0x190] sm:$0xf]  ;;  %v3494_v5 = vor.u32 %v4356_v55, %v3493_v50 }
 0x19e   :  { %2555 = vmatpush.bf16.msrb.mxu0 %v3874_v9  ;;  %2569 = vmatpush.bf16.msrb.mxu1 %v4066_v10  ;;  %v3350_v9 = vor.u32 %v4320_v1, %v3349_v0  ;;  %v3133_v10 = vld [vmem:[#allocation7 + $0xa0] sm:$0xf]  ;;  %v3278_v0 = vor.u32 %v4302_v49, %v3277_v48  ;;  %v3061_v1 = vld [vmem:[#allocation7 + $0x10] sm:$0xf] }
 0x19f   :  { %v3134_v25 = vor.u32 %v4266_v13, %v3133_v10  ;;  %v3997_v10 = vld [vmem:[#allocation7 + $0x760] sm:$0xf]  ;;  %v4482_v13 = vld [vmem:[#allocation7 + $0x774] sm:$0xf0] }
 0x1a0   :  { %2529 = vmatpush.bf16.msra.mxu2 %v3442_v20  ;;  %2543 = vmatpush.bf16.msra.mxu3 %v3634_v21  ;;  %v3733_v20 = vld [vmem:[#allocation7 + $0x550] sm:$0xf]  ;;  %v4416_v21 = vld [vmem:[#allocation7 + $0x564] sm:$0xf0] }
 0x1a1   :  { %v3734_v31 = vor.u32 %v4416_v21, %v3733_v20  ;;  %v791_v20 = vperm.slane %v4860_v60, 1 }
 0x1a2   :  { %2556 = vmatpush.bf16.msrb.mxu0 %v3850_v27  ;;  %2570 = vmatpush.bf16.msrb.mxu1 %v4042_v28  ;;  %v3109_v27 = vld [vmem:[#allocation7 + $0x70] sm:$0xf]  ;;  %v4260_v28 = vld [vmem:[#allocation7 + $0x84] sm:$0xf0] }
 0x1a3   :  { %2530 = vmatmul.bf16.vlgmr.msra.gmra.mxu2 %v4832_v11  ;;  %2544 = vmatmul.bf16.vlgmr.msra.gmra.mxu3 %v4834_v12 }
 0x1a4   :  { %2578 = vmatpush.bf16.msrb.mxu2 %v3230_v22  ;;  %2592 = vmatpush.bf16.msrb.mxu3 %v3422_v23 }
 0x1a5   :  { %v2251_v17 = vpop.f32.mrf.mxu2  ;;  %v2265_v18 = vpop.f32.mrf.mxu3 }
 0x1a6   :  { %2557 = vmatpush.bf16.msrb.mxu0 %v3826_v42  ;;  %2571 = vmatpush.bf16.msrb.mxu1 %v4018_v43  ;;  %v2252_v22 = vadd.f32 %v2251_v17, %v790_v6  ;;  %v2279_v23 = vpop.f32.mrf.mxu0  ;;  %v2293_v24 = vpop.f32.mrf.mxu1  ;;  %v3302_v42 = vor.u32 %v4308_v33, %v3301_v32  ;;  %v3085_v43 = vld [vmem:[#allocation7 + $0x40] sm:$0xf]  ;;  %v4398_v17 = vld [vmem:[#allocation7 + $0x4d4] sm:$0xf0] }
 0x1a8   :  { %2579 = vmatpush.bf16.msrb.mxu2 %v3206_v38  ;;  %2593 = vmatpush.bf16.msrb.mxu3 %v3398_v39  ;;  %v2266_v29 = vadd.f32 %v2265_v18, %v2252_v22  ;;  %v3110_v39 = vor.u32 %v4260_v28, %v3109_v27  ;;  %v3062_v18 = vor.u32 %v4248_v2, %v3061_v1  ;;  %v3399_v1 = vld [vmem:[#allocation7 + $0x2c8] sm:$0xf0] }
 0x1a9   :  { %2558 = vmatmul.bf16.vlgmr.msrb.gmra.mxu0 %v4838_v40  ;;  %2572 = vmatmul.bf16.vlgmr.msrb.gmra.mxu1 %v4840_v41  ;;  %v3998_v22 = vor.u32 %v4482_v13, %v3997_v10  ;;  %v3662_v28 = vor.u32 %v4398_v17, %v3661_v16  ;;  %v3183_v16 = vld [vmem:[#allocation7 + $0x118] sm:$0xf0]  ;;  %v4323_v17 = vld [vmem:[#allocation7 + $0x284] sm:$0xf] }
 0x1aa   :  { %2606 = vmatpush.bf16.msra.mxu0 %v3614_v46  ;;  %2620 = vmatpush.bf16.msra.mxu1 %v3806_v47  ;;  %v2280_v38 = vadd.f32 %v2279_v23, %v2266_v29  ;;  %v3518_v46 = vor.u32 %v4362_v35, %v3517_v34  ;;  %v3710_v47 = vor.u32 %v4410_v37, %v3709_v36  ;;  %v4524_v29 = vld [vmem:[#allocation7 + $0x8c4] sm:$0xf0]  ;;  %v3637_v34 = vld [vmem:[#allocation7 + $0x490] sm:$0xf]  ;;  %v4287_v36 = vld [vmem:[#allocation7 + $0x164] sm:$0xf] }
 0x1ab   :  { %v4392_v35 = vld [vmem:[#allocation7 + $0x4a4] sm:$0xf0] }
 0x1ac   :  { %2580 = vmatpush.bf16.msrb.mxu2 %v3182_v56  ;;  %2594 = vmatpush.bf16.msrb.mxu3 %v3374_v57  ;;  %v4865_v45 = vadd.f32 %v2293_v24, %v2280_v38  ;;  %v3685_v56 = vld [vmem:[#allocation7 + $0x4f0] sm:$0xf]  ;;  %v4404_v57 = vld [vmem:[#allocation7 + $0x504] sm:$0xf0] }
 0x1ad   :  { %v2253_v53 = vpop.f32.mrf.mxu2  ;;  %v2267_v54 = vpop.f32.mrf.mxu3  ;;  %v3973_v24 = vld [vmem:[#allocation7 + $0x730] sm:$0xf] }
 0x1ae   :  { %2607 = vmatpush.bf16.msra.mxu0 %v3590_v62  ;;  %2621 = vmatpush.bf16.msra.mxu1 %v3782_v63  ;;  %v2254_v58 = vadd.f32 %v2253_v53, %v790_v6  ;;  %v2281_v59 = vpop.f32.mrf.mxu0  ;;  %v2295_v62 = vpop.f32.mrf.mxu1  ;;  %v3086_v63 = vor.u32 %v4254_v44, %v3085_v43  ;;  %v3469_v6 = vld [vmem:[#allocation7 + $0x340] sm:$0xf]  ;;  %v4335_v43 = vld [vmem:[#allocation7 + $0x2e4] sm:$0xf]  ;;  %v3423_v44 = vld [vmem:[#allocation7 + $0x2f8] sm:$0xf0]  ;;  %v3638_v53 = vor.u32 %v4392_v35, %v3637_v34 }
 0x1af   :  { %v3470_v27 = vor.u32 %v4350_v15, %v3469_v6  ;;  %v4275_v6 = vld [vmem:[#allocation7 + $0x104] sm:$0xf]  ;;  %v3351_v34 = vld [vmem:[#allocation7 + $0x268] sm:$0xf0] }
 0x1b0   :  { %2581 = vmatpush.bf16.msrb.mxu2 %v3158_v8  ;;  %2595 = vmatpush.bf16.msrb.mxu3 %v3350_v9  ;;  %v2268_v4 = vadd.f32 %v2267_v54, %v2254_v58  ;;  %v3686_v8 = vor.u32 %v4404_v57, %v3685_v56  ;;  %v4296_v9 = vld [vmem:[#allocation7 + $0x1a4] sm:$0xf0]  ;;  %v3949_v54 = vld [vmem:[#allocation7 + $0x700] sm:$0xf]  ;;  %v3426_v57 = vor.u32 %v4335_v43, %v3423_v44 }
 0x1b1   :  { %v3254_v19 = vor.u32 %v4296_v9, %v3253_v3  ;;  %v4141_v58 = vld [vmem:[#allocation7 + $0x880] sm:$0xf] }
 0x1b2   :  { %2608 = vmatpush.bf16.msra.mxu0 %v3566_v61  ;;  %2622 = vmatpush.bf16.msra.mxu1 %v3758_v7  ;;  %v4189_v61 = vld [vmem:[#allocation7 + $0x8e0] sm:$0xf]  ;;  %v4530_v7 = vld [vmem:[#allocation7 + $0x8f4] sm:$0xf0]  ;;  %v2282_v14 = vadd.f32 %v2281_v59, %v2268_v4  ;;  %v3925_v4 = vld [vmem:[#allocation7 + $0x6d0] sm:$0xf] }
 0x1b3   :  { %v4190_v23 = vor.u32 %v4530_v7, %v4189_v61  ;;  %v4518_v59 = vld [vmem:[#allocation7 + $0x894] sm:$0xf0]  ;;  %v4117_v61 = vld [vmem:[#allocation7 + $0x850] sm:$0xf]  ;;  %v4512_v7 = vld [vmem:[#allocation7 + $0x864] sm:$0xf0] }
 0x1b4   :  { %2582 = vmatpush.bf16.msrb.mxu2 %v3134_v25  ;;  %2596 = vmatpush.bf16.msrb.mxu3 %v3326_v26  ;;  %v4868_v21 = vadd.f32 %v2295_v62, %v2282_v14  ;;  %v4476_v25 = vld [vmem:[#allocation7 + $0x744] sm:$0xf0]  ;;  %v4165_v26 = vld [vmem:[#allocation7 + $0x8b0] sm:$0xf]  ;;  %v4281_v62 = vld [vmem:[#allocation7 + $0x134] sm:$0xf]  ;;  %v4142_v3 = vor.u32 %v4518_v59, %v4141_v58 }
 0x1b5   :  { %v4166_v48 = vor.u32 %v4524_v29, %v4165_v26  ;;  %v3901_v26 = vld [vmem:[#allocation7 + $0x6a0] sm:$0xf] }
 0x1b6   :  { %2609 = vmatpush.bf16.msra.mxu0 %v3542_v30  ;;  %2623 = vmatpush.bf16.msra.mxu1 %v3734_v31  ;;  %v3445_v30 = vld [vmem:[#allocation7 + $0x310] sm:$0xf]  ;;  %v4344_v31 = vld [vmem:[#allocation7 + $0x324] sm:$0xf0]  ;;  %v2307_v32 = vpop.f32.mrf.mxu2  ;;  %v2321_v33 = vpop.f32.mrf.mxu3 }
 0x1b7   :  { %v2308_v37 = vadd.f32 %v2307_v32, %v4865_v45  ;;  %v2335_v38 = vpop.f32.mrf.mxu0  ;;  %v3446_v50 = vor.u32 %v4344_v31, %v3445_v30  ;;  %v4470_v45 = vld [vmem:[#allocation7 + $0x714] sm:$0xf0]  ;;  %v4093_v30 = vld [vmem:[#allocation7 + $0x820] sm:$0xf]  ;;  %v4269_v32 = vld [vmem:[#allocation7 + $0xd4] sm:$0xf] }
 0x1b8   :  { %2583 = vmatpush.bf16.msrb.mxu2 %v3110_v39  ;;  %2597 = vmatpush.bf16.msrb.mxu3 %v3302_v42  ;;  %v2349_v39 = vpop.f32.mrf.mxu1  ;;  %v3231_v42 = vld [vmem:[#allocation7 + $0x178] sm:$0xf0]  ;;  %v3950_v2 = vor.u32 %v4470_v45, %v3949_v54  ;;  %v4506_v31 = vld [vmem:[#allocation7 + $0x834] sm:$0xf0]  ;;  %v4311_v54 = vld [vmem:[#allocation7 + $0x224] sm:$0xf] }
 0x1b9   :  { %v4873_v49 = vadd.f32 %v2321_v33, %v2308_v37  ;;  %v3234_v56 = vor.u32 %v4287_v36, %v3231_v42  ;;  %v3159_v33 = vld [vmem:[#allocation7 + $0xe8] sm:$0xf0]  ;;  %v4094_v36 = vor.u32 %v4506_v31, %v4093_v30  ;;  %v3877_v37 = vld [vmem:[#allocation7 + $0x670] sm:$0xf]  ;;  %v3327_v45 = vld [vmem:[#allocation7 + $0x238] sm:$0xf0] }
 0x1ba   :  { %2610 = vmatpush.bf16.msra.mxu0 %v3518_v46  ;;  %2624 = vmatpush.bf16.msra.mxu1 %v3710_v47  ;;  %v2336_v46 = vadd.f32 %v2335_v38, %v791_v20  ;;  %v3974_v47 = vor.u32 %v4476_v25, %v3973_v24  ;;  %v4118_v25 = vor.u32 %v4512_v7, %v4117_v61  ;;  %v4452_v38 = vld [vmem:[#allocation7 + $0x684] sm:$0xf0]  ;;  %v3087_v31 = vld [vmem:[#allocation7 + $0x58] sm:$0xf0] }
 0x1bb   :  { %v3162_v43 = vor.u32 %v4269_v32, %v3159_v33  ;;  %v3878_v59 = vor.u32 %v4452_v38, %v3877_v37  ;;  %4563 = vtanh.f32 %v4873_v49  ;;  %v4431_v49 = vld [vmem:[#allocation7 + $0x5e4] sm:$0xf]  ;;  %v3279_v33 = vld [vmem:[#allocation7 + $0x1d8] sm:$0xf0] }
 0x1bc   :  { %2584 = vmatpush.bf16.msrb.mxu2 %v3086_v63  ;;  %2598 = vmatpush.bf16.msrb.mxu3 %v3278_v0  ;;  %v4875_v55 = vadd.f32 %v2349_v39, %v2336_v46  ;;  %v3207_v63 = vld [vmem:[#allocation7 + $0x148] sm:$0xf0]  ;;  %v4329_v0 = vld [vmem:[#allocation7 + $0x2b4] sm:$0xf]  ;;  %v4069_v46 = vld [vmem:[#allocation7 + $0x7f0] sm:$0xf] }
 0x1bd   :  { %v3210_v10 = vor.u32 %v4281_v62, %v3207_v63  ;;  %v3402_v13 = vor.u32 %v4329_v0, %v3399_v1  ;;  %v3853_v63 = vld [vmem:[#allocation7 + $0x640] sm:$0xf]  ;;  %v4446_v0 = vld [vmem:[#allocation7 + $0x654] sm:$0xf0]  ;;  %v4299_v32 = vld [vmem:[#allocation7 + $0x1c4] sm:$0xf] }
 0x1be   :  { %2611 = vmatpush.bf16.msra.mxu0 %v3494_v5  ;;  %2625 = vmatpush.bf16.msra.mxu1 %v3686_v8  ;;  %v4464_v5 = vld [vmem:[#allocation7 + $0x6e4] sm:$0xf0]  ;;  %v2309_v8 = vpop.f32.mrf.mxu2  ;;  %v2323_v9 = vpop.f32.mrf.mxu3 }
 0x1bf   :  { %v2310_v14 = vadd.f32 %v2309_v8, %v4868_v21  ;;  %v2337_v15 = vpop.f32.mrf.mxu0  ;;  %v3926_v24 = vor.u32 %v4464_v5, %v3925_v4  ;;  %v4458_v21 = vld [vmem:[#allocation7 + $0x6b4] sm:$0xf0]  ;;  %v4045_v4 = vld [vmem:[#allocation7 + $0x7c0] sm:$0xf]  ;;  %v4257_v5 = vld [vmem:[#allocation7 + $0x74] sm:$0xf] }
 0x1c0   :  { %2585 = vmatpush.bf16.msrb.mxu2 %v3062_v18  ;;  %2599 = vmatpush.bf16.msrb.mxu3 %v3254_v19  ;;  %v3375_v18 = vld [vmem:[#allocation7 + $0x298] sm:$0xf0]  ;;  %v2338_v19 = vadd.f32 %v2337_v15, %v791_v20  ;;  %v4317_v20 = vld [vmem:[#allocation7 + $0x254] sm:$0xf]  ;;  %v3902_v35 = vor.u32 %v4458_v21, %v3901_v26  ;;  %v3829_v15 = vld [vmem:[#allocation7 + $0x610] sm:$0xf] }
 0x1c1   :  { %v3378_v29 = vor.u32 %v4323_v17, %v3375_v18  ;;  %v3354_v44 = vor.u32 %v4317_v20, %v3351_v34  ;;  %v4021_v17 = vld [vmem:[#allocation7 + $0x790] sm:$0xf]  ;;  %v3615_v26 = vld [vmem:[#allocation7 + $0x478] sm:$0xf0] }
 0x1c2   :  { %2612 = vmatpush.bf16.msra.mxu0 %v3470_v27  ;;  %2626 = vmatpush.bf16.msra.mxu1 %v3662_v28  ;;  %v3186_v28 = vor.u32 %v4275_v6, %v3183_v16  ;;  %v3854_v6 = vor.u32 %v4446_v0, %v3853_v63  ;;  %v4440_v16 = vld [vmem:[#allocation7 + $0x624] sm:$0xf0] }
 0x1c3   :  { %2586 = vmatmul.bf16.vlgmr.msrb.gmra.mxu2 %v4826_v51  ;;  %2600 = vmatmul.bf16.vlgmr.msrb.gmra.mxu3 %v4828_v52 }
 0x1c4   :  { %2634 = vmatpush.bf16.msra.mxu2 %v3998_v22  ;;  %2648 = vmatpush.bf16.msra.mxu3 %v4190_v23  ;;  %v2351_v22 = vpop.f32.mrf.mxu1  ;;  %v4884_v23 = vadd.f32 %v2323_v9, %v2310_v14  ;;  %v3111_v9 = vld [vmem:[#allocation7 + $0x88] sm:$0xf0] }
 0x1c5   :  { %v4886_v27 = vadd.f32 %v2351_v22, %v2338_v19  ;;  %v3114_v19 = vor.u32 %v4257_v5, %v3111_v9  ;;  %v4371_v9 = vld [vmem:[#allocation7 + $0x404] sm:$0xf] }
 0x1c6   :  { %2613 = vmatpush.bf16.msra.mxu0 %v3446_v50  ;;  %2627 = vmatpush.bf16.msra.mxu1 %v3638_v53  ;;  %v2363_v39 = vpop.f32.mrf.mxu2  ;;  %v2377_v42 = vpop.f32.mrf.mxu3  ;;  %v3135_v53 = vld [vmem:[#allocation7 + $0xb8] sm:$0xf0] }
 0x1c7   :  { %v2364_v50 = vadd.f32 %v2363_v39, %v4875_v55  ;;  %v4494_v55 = vld [vmem:[#allocation7 + $0x7d4] sm:$0xf0] }
 0x1c8   :  { %2635 = vmatpush.bf16.msra.mxu2 %v3974_v47  ;;  %2649 = vmatpush.bf16.msra.mxu3 %v4166_v48  ;;  %v4500_v47 = vld [vmem:[#allocation7 + $0x804] sm:$0xf0]  ;;  %v4263_v48 = vld [vmem:[#allocation7 + $0xa4] sm:$0xf]  ;;  %v4046_v14 = vor.u32 %v4494_v55, %v4045_v4 }
 0x1c9   :  { %2614 = vmatmul.bf16.vlgmr.msra.gmra.mxu0 %v4832_v11  ;;  %2628 = vmatmul.bf16.vlgmr.msra.gmra.mxu1 %v4834_v12  ;;  %v2378_v58 = vadd.f32 %v2377_v42, %v2364_v50  ;;  %v4070_v62 = vor.u32 %v4500_v47, %v4069_v46  ;;  %v3591_v42 = vld [vmem:[#allocation7 + $0x448] sm:$0xf0] }
 0x1ca   :  { %2662 = vmatpush.bf16.msrb.mxu0 %v3234_v56  ;;  %2676 = vmatpush.bf16.msrb.mxu1 %v3426_v57  ;;  %v2391_v56 = vpop.f32.mrf.mxu0  ;;  %v4889_v57 = vld [vmem:[#allocation10] sm:$0x3f]  ;;  %v3783_v50 = vld [vmem:[#allocation7 + $0x5c8] sm:$0xf0] }
 0x1cb   :  { %v2392_v8 = vadd.f32 %v2391_v56, %v2378_v58  ;;  %v2760_v61 = vperm.slane %v4889_v57, 0  ;;  %v2761_v20 = vperm.slane %v4889_v57, 1  ;;  %v4293_v56 = vld [vmem:[#allocation7 + $0x194] sm:$0xf]  ;;  %v3255_v58 = vld [vmem:[#allocation7 + $0x1a8] sm:$0xf0] }
 0x1cc   :  { %2636 = vmatpush.bf16.msra.mxu2 %v3950_v2  ;;  %2650 = vmatpush.bf16.msra.mxu3 %v4142_v3  ;;  %v2405_v1 = vpop.f32.mrf.mxu1  ;;  %v3138_v2 = vor.u32 %v4263_v48, %v3135_v53  ;;  %v3330_v3 = vor.u32 %v4311_v54, %v3327_v45  ;;  %v3282_v48 = vor.u32 %v4299_v32, %v3279_v33  ;;  %v4245_v53 = vld [vmem:[#allocation7 + $0x14] sm:$0xf]  ;;  %v3063_v54 = vld [vmem:[#allocation7 + $0x28] sm:$0xf0]  ;;  %v3951_v33 = vld [vmem:[#allocation7 + $0x718] sm:$0xf0] }
 0x1cd   :  { %v2406_v7 = vadd.f32 %v2405_v1, %v2392_v8  ;;  %v3999_v1 = vld [vmem:[#allocation7 + $0x778] sm:$0xf0]  ;;  %v3258_v8 = vor.u32 %v4293_v56, %v3255_v58  ;;  %v4353_v58 = vld [vmem:[#allocation7 + $0x374] sm:$0xf] }
 0x1ce   :  { %2663 = vmatpush.bf16.msrb.mxu0 %v3210_v10  ;;  %2677 = vmatpush.bf16.msrb.mxu1 %v3402_v13  ;;  %v4305_v10 = vld [vmem:[#allocation7 + $0x1f4] sm:$0xf]  ;;  %v3303_v13 = vld [vmem:[#allocation7 + $0x208] sm:$0xf0]  ;;  %v2365_v18 = vpop.f32.mrf.mxu2  ;;  %v2379_v30 = vpop.f32.mrf.mxu3 }
 0x1cf   :  { %v3306_v22 = vor.u32 %v4305_v10, %v3303_v13  ;;  %4565 = vtanh.f32 %v2406_v7  ;;  %v2366_v21 = vadd.f32 %v2365_v18, %v4886_v27  ;;  %v4377_v27 = vld [vmem:[#allocation7 + $0x434] sm:$0xf]  ;;  %v3567_v10 = vld [vmem:[#allocation7 + $0x418] sm:$0xf0] }
 0x1d0   :  { %2637 = vmatpush.bf16.msra.mxu2 %v3926_v24  ;;  %2651 = vmatpush.bf16.msra.mxu3 %v4118_v25  ;;  %v4488_v24 = vld [vmem:[#allocation7 + $0x7a4] sm:$0xf0]  ;;  %v4383_v25 = vld [vmem:[#allocation7 + $0x464] sm:$0xf]  ;;  %4567 = vtanh.f32 %v4884_v23  ;;  %v3594_v0 = vor.u32 %v4377_v27, %v3591_v42  ;;  %v3066_v23 = vor.u32 %v4245_v53, %v3063_v54  ;;  %v4521_v18 = vld [vmem:[#allocation7 + $0x8b4] sm:$0xf] }
 0x1d1   :  { %v2380_v34 = vadd.f32 %v2379_v30, %v2366_v21  ;;  %v3618_v38 = vor.u32 %v4383_v25, %v3615_v26  ;;  %v4365_v26 = vld [vmem:[#allocation7 + $0x3d4] sm:$0xf]  ;;  %v3543_v21 = vld [vmem:[#allocation7 + $0x3e8] sm:$0xf0]  ;;  %v4359_v27 = vld [vmem:[#allocation7 + $0x3a4] sm:$0xf] }
 0x1d2   :  { %2664 = vmatpush.bf16.msrb.mxu0 %v3186_v28  ;;  %2678 = vmatpush.bf16.msrb.mxu1 %v3378_v29  ;;  %v3807_v28 = vld [vmem:[#allocation7 + $0x5f8] sm:$0xf0]  ;;  %v4251_v29 = vld [vmem:[#allocation7 + $0x44] sm:$0xf]  ;;  %v2393_v37 = vpop.f32.mrf.mxu0  ;;  %v3735_v30 = vld [vmem:[#allocation7 + $0x568] sm:$0xf0] }
 0x1d3   :  { %v3810_v39 = vor.u32 %v4431_v49, %v3807_v28  ;;  %v2394_v46 = vadd.f32 %v2393_v37, %v2380_v34  ;;  %v3090_v47 = vor.u32 %v4251_v29, %v3087_v31  ;;  %v4413_v29 = vld [vmem:[#allocation7 + $0x554] sm:$0xf]  ;;  %v4467_v31 = vld [vmem:[#allocation7 + $0x704] sm:$0xf]  ;;  %v3519_v42 = vld [vmem:[#allocation7 + $0x3b8] sm:$0xf0] }
 0x1d4   :  { %2638 = vmatpush.bf16.msra.mxu2 %v3902_v35  ;;  %2652 = vmatpush.bf16.msra.mxu3 %v4094_v36  ;;  %v3830_v35 = vor.u32 %v4440_v16, %v3829_v15  ;;  %v4022_v36 = vor.u32 %v4488_v24, %v4021_v17  ;;  %v2407_v45 = vpop.f32.mrf.mxu1  ;;  %v4473_v15 = vld [vmem:[#allocation7 + $0x734] sm:$0xf]  ;;  %v3975_v17 = vld [vmem:[#allocation7 + $0x748] sm:$0xf0]  ;;  %v3570_v24 = vor.u32 %v4371_v9, %v3567_v10  ;;  %v4515_v34 = vld [vmem:[#allocation7 + $0x884] sm:$0xf] }
 0x1d5   :  { %v2408_v63 = vadd.f32 %v2407_v45, %v2394_v46  ;;  %v3978_v49 = vor.u32 %v4473_v15, %v3975_v17  ;;  %v3522_v53 = vor.u32 %v4359_v27, %v3519_v42  ;;  %v4491_v27 = vld [vmem:[#allocation7 + $0x7c4] sm:$0xf]  ;;  %v4047_v42 = vld [vmem:[#allocation7 + $0x7d8] sm:$0xf0] }
 0x1d6   :  { %2665 = vmatpush.bf16.msrb.mxu0 %v3162_v43  ;;  %2679 = vmatpush.bf16.msrb.mxu1 %v3354_v44  ;;  %v4425_v43 = vld [vmem:[#allocation7 + $0x5b4] sm:$0xf]  ;;  %v4564_v44 = vpop.eup %4563 }
 0x1d7   :  { %v2772_v4 = vmul.f32 %v4564_v44, %v2760_v61  ;;  %v3786_v5 = vor.u32 %v4425_v43, %v3783_v50  ;;  %4569 = vtanh.f32 %v2408_v63  ;;  %v4407_v43 = vld [vmem:[#allocation7 + $0x524] sm:$0xf]  ;;  %v3954_v44 = vor.u32 %v4467_v31, %v3951_v33  ;;  %v4509_v50 = vld [vmem:[#allocation7 + $0x854] sm:$0xf]  ;;  %v3447_v31 = vld [vmem:[#allocation7 + $0x328] sm:$0xf0] }
 0x1d8   :  { %2639 = vmatpush.bf16.msra.mxu2 %v3878_v59  ;;  %2653 = vmatpush.bf16.msra.mxu3 %v4070_v62  ;;  %v4479_v59 = vld [vmem:[#allocation7 + $0x764] sm:$0xf]  ;;  %v4566_v62 = vpop.eup %4565 }
 0x1d9   :  { %v2773_v55 = vmul.f32 %v4566_v62, %v2761_v20  ;;  %v4002_v13 = vor.u32 %v4479_v59, %v3999_v1  ;;  %v3495_v59 = vld [vmem:[#allocation7 + $0x388] sm:$0xf0]  ;;  %v4401_v1 = vld [vmem:[#allocation7 + $0x4f4] sm:$0xf] }
 0x1da   :  { %2666 = vmatpush.bf16.msrb.mxu0 %v3138_v2  ;;  %2680 = vmatpush.bf16.msrb.mxu1 %v3330_v3  ;;  %v4527_v2 = vld [vmem:[#allocation7 + $0x8e4] sm:$0xf]  ;;  %v4191_v3 = vld [vmem:[#allocation7 + $0x8f8] sm:$0xf0]  ;;  %v3498_v10 = vor.u32 %v4353_v58, %v3495_v59 }
 0x1db   :  { %v4194_v7 = vor.u32 %v4527_v2, %v4191_v3  ;;  %v4902_v16 = vadd.f32 %v2773_v55, %v2772_v4  ;;  %v3687_v2 = vld [vmem:[#allocation7 + $0x508] sm:$0xf0]  ;;  %v4455_v3 = vld [vmem:[#allocation7 + $0x6a4] sm:$0xf]  ;;  %v3903_v55 = vld [vmem:[#allocation7 + $0x6b8] sm:$0xf0] }
 0x1dc   :  { %2640 = vmatpush.bf16.msra.mxu2 %v3854_v6  ;;  %2654 = vmatpush.bf16.msra.mxu3 %v4046_v14  ;;  %v4419_v6 = vld [vmem:[#allocation7 + $0x584] sm:$0xf]  ;;  %v3759_v14 = vld [vmem:[#allocation7 + $0x598] sm:$0xf0]  ;;  %v3906_v15 = vor.u32 %v4455_v3, %v3903_v55 }
 0x1dd   :  { %v3762_v25 = vor.u32 %v4419_v6, %v3759_v14  ;;  %v3471_v6 = vld [vmem:[#allocation7 + $0x358] sm:$0xf0] }
 0x1de   :  { %2667 = vmatpush.bf16.msrb.mxu0 %v3114_v19  ;;  %2681 = vmatpush.bf16.msrb.mxu1 %v3306_v22  ;;  %v4167_v19 = vld [vmem:[#allocation7 + $0x8c8] sm:$0xf0]  ;;  %v4568_v22 = vpop.eup %4567 }
 0x1df   :  { %v4170_v28 = vor.u32 %v4521_v18, %v4167_v19  ;;  %v4570_v32 = vpop.eup %4569  ;;  %v4395_v18 = vld [vmem:[#allocation7 + $0x4c4] sm:$0xf]  ;;  %v3663_v19 = vld [vmem:[#allocation7 + $0x4d8] sm:$0xf0] }
 0x1e0   :  { %2641 = vmatpush.bf16.msra.mxu2 %v3830_v35  ;;  %2655 = vmatpush.bf16.msra.mxu3 %v4022_v36  ;;  %v4143_v35 = vld [vmem:[#allocation7 + $0x898] sm:$0xf0]  ;;  %v2778_v36 = vmul.f32 %v4568_v22, %v2760_v61  ;;  %v2779_v37 = vmul.f32 %v4570_v32, %v2761_v20  ;;  %v792_v61 = vperm.slane %v4860_v60, 2  ;;  %v4449_v22 = vld [vmem:[#allocation7 + $0x674] sm:$0xf] }
 0x1e1   :  { %v4146_v46 = vor.u32 %v4515_v34, %v4143_v35  ;;  %v4389_v35 = vld [vmem:[#allocation7 + $0x494] sm:$0xf] }
 0x1e2   :  { %2668 = vmatpush.bf16.msrb.mxu0 %v3090_v47  ;;  %2682 = vmatpush.bf16.msrb.mxu1 %v3282_v48  ;;  %v3711_v47 = vld [vmem:[#allocation7 + $0x538] sm:$0xf0]  ;;  %v4461_v48 = vld [vmem:[#allocation7 + $0x6d4] sm:$0xf]  ;;  %v4911_v20 = vadd.f32 %v2779_v37, %v2778_v36  ;;  %v3639_v36 = vld [vmem:[#allocation7 + $0x4a8] sm:$0xf0] }
 0x1e3   :  { %2642 = vmatmul.bf16.vlgmr.msra.gmra.mxu2 %v4838_v40  ;;  %2656 = vmatmul.bf16.vlgmr.msra.gmra.mxu3 %v4840_v41  ;;  %v3714_v54 = vor.u32 %v4407_v43, %v3711_v47  ;;  %v4443_v37 = vld [vmem:[#allocation7 + $0x644] sm:$0xf]  ;;  %v3642_v47 = vor.u32 %v4389_v35, %v3639_v36 }
 0x1e4   :  { %2690 = vmatpush.bf16.msrb.mxu2 %v3618_v38  ;;  %2704 = vmatpush.bf16.msrb.mxu3 %v3810_v39  ;;  %v3546_v38 = vor.u32 %v4365_v26, %v3543_v21  ;;  %v3738_v39 = vor.u32 %v4413_v29, %v3735_v30  ;;  %v4071_v26 = vld [vmem:[#allocation7 + $0x808] sm:$0xf0]  ;;  %v4341_v30 = vld [vmem:[#allocation7 + $0x314] sm:$0xf] }
 0x1e6   :  { %2669 = vmatpush.bf16.msrb.mxu0 %v3066_v23  ;;  %2683 = vmatpush.bf16.msrb.mxu1 %v3258_v8  ;;  %v2419_v45 = vpop.f32.mrf.mxu2  ;;  %v2433_v56 = vpop.f32.mrf.mxu3  ;;  %v4095_v23 = vld [vmem:[#allocation7 + $0x838] sm:$0xf0] }
 0x1e7   :  { %v2420_v62 = vadd.f32 %v2419_v45, %v792_v61  ;;  %v2447_v4 = vpop.f32.mrf.mxu0  ;;  %v2461_v9 = vpop.f32.mrf.mxu1  ;;  %v4023_v45 = vld [vmem:[#allocation7 + $0x7a8] sm:$0xf0] }
 0x1e8   :  { %2691 = vmatpush.bf16.msrb.mxu2 %v3594_v0  ;;  %2705 = vmatpush.bf16.msrb.mxu3 %v3786_v5  ;;  %v4503_v5 = vld [vmem:[#allocation7 + $0x824] sm:$0xf] }
 0x1e9   :  { %2670 = vmatmul.bf16.vlgmr.msrb.gmra.mxu0 %v4826_v51  ;;  %2684 = vmatmul.bf16.vlgmr.msrb.gmra.mxu1 %v4828_v52  ;;  %v3927_v51 = vld [vmem:[#allocation7 + $0x6e8] sm:$0xf0]  ;;  %v2434_v8 = vadd.f32 %v2433_v56, %v2420_v62  ;;  %v4098_v17 = vor.u32 %v4503_v5, %v4095_v23 }
 0x1ea   :  { %2718 = vmatpush.bf16.msra.mxu0 %v4002_v13  ;;  %2732 = vmatpush.bf16.msra.mxu1 %v4194_v7  ;;  %v4119_v52 = vld [vmem:[#allocation7 + $0x868] sm:$0xf0]  ;;  %v3930_v63 = vor.u32 %v4461_v48, %v3927_v51  ;;  %v3690_v13 = vor.u32 %v4401_v1, %v3687_v2  ;;  %v4347_v7 = vld [vmem:[#allocation7 + $0x344] sm:$0xf]  ;;  %v2762_v2 = vperm.slane %v4889_v57, 2 }
 0x1eb   :  { %v4122_v0 = vor.u32 %v4509_v50, %v4119_v52  ;;  %v2448_v14 = vadd.f32 %v2447_v4, %v2434_v8  ;;  %v4437_v50 = vld [vmem:[#allocation7 + $0x614] sm:$0xf] }
 0x1ec   :  { %2692 = vmatpush.bf16.msrb.mxu2 %v3570_v24  ;;  %2706 = vmatpush.bf16.msrb.mxu3 %v3762_v25  ;;  %v3879_v24 = vld [vmem:[#allocation7 + $0x688] sm:$0xf0]  ;;  %v4497_v25 = vld [vmem:[#allocation7 + $0x7f4] sm:$0xf] }
 0x1ed   :  { %v2462_v21 = vadd.f32 %v2461_v9, %v2448_v14  ;;  %v3882_v33 = vor.u32 %v4449_v22, %v3879_v24  ;;  %v4074_v34 = vor.u32 %v4497_v25, %v4071_v26 }
 0x1ee   :  { %2719 = vmatpush.bf16.msra.mxu0 %v3978_v49  ;;  %2733 = vmatpush.bf16.msra.mxu1 %v4170_v28  ;;  %v3474_v49 = vor.u32 %v4347_v7, %v3471_v6  ;;  %v3666_v28 = vor.u32 %v4395_v18, %v3663_v19  ;;  %v2421_v29 = vpop.f32.mrf.mxu2 }
 0x1ef   :  { %v2422_v32 = vadd.f32 %v2421_v29, %v792_v61  ;;  %v4050_v61 = vor.u32 %v4491_v27, %v4047_v42  ;;  %v2463_v52 = vpop.f32.mrf.mxu1 }
 0x1f0   :  { %2693 = vmatpush.bf16.msrb.mxu2 %v3546_v38  ;;  %2707 = vmatpush.bf16.msrb.mxu3 %v3738_v39  ;;  %v2435_v38 = vpop.f32.mrf.mxu3  ;;  %v3855_v39 = vld [vmem:[#allocation7 + $0x658] sm:$0xf0] }
 0x1f1   :  { %v2436_v43 = vadd.f32 %v2435_v38, %v2422_v32  ;;  %v3858_v51 = vor.u32 %v4443_v37, %v3855_v39 }
 0x1f2   :  { %2720 = vmatpush.bf16.msra.mxu0 %v3954_v44  ;;  %2734 = vmatpush.bf16.msra.mxu1 %v4146_v46  ;;  %v2449_v44 = vpop.f32.mrf.mxu0  ;;  %v3450_v46 = vor.u32 %v4341_v30, %v3447_v31  ;;  %v794_v30 = vperm.slane %v4860_v60, 4 }
 0x1f3   :  { %v2450_v48 = vadd.f32 %v2449_v44, %v2436_v43 }
 0x1f4   :  { %2694 = vmatpush.bf16.msrb.mxu2 %v3522_v53  ;;  %2708 = vmatpush.bf16.msrb.mxu3 %v3714_v54  ;;  %v3831_v53 = vld [vmem:[#allocation7 + $0x628] sm:$0xf0]  ;;  %v4485_v54 = vld [vmem:[#allocation7 + $0x794] sm:$0xf] }
 0x1f5   :  { %v2464_v56 = vadd.f32 %v2463_v52, %v2450_v48  ;;  %v3834_v58 = vor.u32 %v4437_v50, %v3831_v53  ;;  %v4026_v59 = vor.u32 %v4485_v54, %v4023_v45  ;;  %v795_v48 = vperm.slane %v4860_v60, 5 }
 0x1f6   :  { %2721 = vmatpush.bf16.msra.mxu0 %v3930_v63  ;;  %2735 = vmatpush.bf16.msra.mxu1 %v4122_v0 }
 0x1f8   :  { %2695 = vmatpush.bf16.msrb.mxu2 %v3498_v10  ;;  %2709 = vmatpush.bf16.msrb.mxu3 %v3690_v13 }
 0x1fa   :  { %2722 = vmatpush.bf16.msra.mxu0 %v3906_v15  ;;  %2736 = vmatpush.bf16.msra.mxu1 %v4098_v17 }
 0x1fc   :  { %2696 = vmatpush.bf16.msrb.mxu2 %v3474_v49  ;;  %2710 = vmatpush.bf16.msrb.mxu3 %v3666_v28 }
 0x1fe   :  { %2723 = vmatpush.bf16.msra.mxu0 %v3882_v33  ;;  %2737 = vmatpush.bf16.msra.mxu1 %v4074_v34 }
 0x200   :  { %2697 = vmatpush.bf16.msrb.mxu2 %v3450_v46  ;;  %2711 = vmatpush.bf16.msrb.mxu3 %v3642_v47 }
 0x202   :  { %2724 = vmatpush.bf16.msra.mxu0 %v3858_v51  ;;  %2738 = vmatpush.bf16.msra.mxu1 %v4050_v61 }
 0x203   :  { %2698 = vmatmul.bf16.vlgmr.msrb.gmra.mxu2 %v4832_v11  ;;  %2712 = vmatmul.bf16.vlgmr.msrb.gmra.mxu3 %v4834_v12 }
 0x206   :  { %2725 = vmatpush.bf16.msra.mxu0 %v3834_v58  ;;  %2739 = vmatpush.bf16.msra.mxu1 %v4026_v59  ;;  %v2475_v62 = vpop.f32.mrf.mxu2  ;;  %v2489_v63 = vpop.f32.mrf.mxu3 }
 0x207   :  { %v2476_v0 = vadd.f32 %v2475_v62, %v2462_v21  ;;  %v2503_v9 = vpop.f32.mrf.mxu0  ;;  %v2517_v10 = vpop.f32.mrf.mxu1 }
 0x209   :  { %2726 = vmatmul.bf16.vlgmr.msra.gmra.mxu0 %v4838_v40  ;;  %2740 = vmatmul.bf16.vlgmr.msra.gmra.mxu1 %v4840_v41  ;;  %v2490_v1 = vadd.f32 %v2489_v63, %v2476_v0 }
 0x20b   :  { %4571 = vtanh.f32 %v2490_v1 }
 0x20e   :  { %v2477_v3 = vpop.f32.mrf.mxu2  ;;  %v2491_v55 = vpop.f32.mrf.mxu3 }
 0x20f   :  { %v2478_v4 = vadd.f32 %v2477_v3, %v2464_v56  ;;  %v2505_v13 = vpop.f32.mrf.mxu0  ;;  %v2519_v7 = vpop.f32.mrf.mxu1 }
 0x211   :  { %v4572_v5 = vpop.eup %4571  ;;  %v2492_v11 = vadd.f32 %v2491_v55, %v2478_v4 }
 0x212   :  { %v2774_v23 = vmul.f32 %v4572_v5, %v2762_v2 }
 0x213   :  { %4573 = vtanh.f32 %v2492_v11 }
 0x214   :  { %v4919_v12 = vadd.f32 %v4902_v16, %v2774_v23 }
 0x219   :  { %v4574_v40 = vpop.eup %4573 }
 0x21a   :  { %v2780_v8 = vmul.f32 %v4574_v40, %v2762_v2 }
 0x21c   :  { %v4922_v41 = vadd.f32 %v4911_v20, %v2780_v8  ;;  %v793_v20 = vperm.slane %v4860_v60, 3 }
 0x21e   :  { %v2504_v32 = vadd.f32 %v2503_v9, %v793_v20  ;;  %v2506_v27 = vadd.f32 %v2505_v13, %v793_v20 }
 0x220   :  { %v2518_v36 = vadd.f32 %v2517_v10, %v2504_v32  ;;  %v2520_v47 = vadd.f32 %v2519_v7, %v2506_v27  ;;  %v2763_v7 = vperm.slane %v4889_v57, 3 }
 0x226   :  { %v2531_v6 = vpop.f32.mrf.mxu2  ;;  %v2545_v14 = vpop.f32.mrf.mxu3 }
 0x227   :  { %v2559_v15 = vpop.f32.mrf.mxu0  ;;  %v2573_v17 = vpop.f32.mrf.mxu1  ;;  %v2532_v38 = vadd.f32 %v2531_v6, %v2518_v36 }
 0x229   :  { %v2546_v43 = vadd.f32 %v2545_v14, %v2532_v38 }
 0x22b   :  { %v2560_v52 = vadd.f32 %v2559_v15, %v2546_v43 }
 0x22d   :  { %v2574_v63 = vadd.f32 %v2573_v17, %v2560_v52 }
 0x22e   :  { %v2533_v18 = vpop.f32.mrf.mxu2  ;;  %v2547_v19 = vpop.f32.mrf.mxu3 }
 0x22f   :  { %v2561_v22 = vpop.f32.mrf.mxu0  ;;  %v2575_v24 = vpop.f32.mrf.mxu1  ;;  %v2534_v51 = vadd.f32 %v2533_v18, %v2520_v47  ;;  %4575 = vtanh.f32 %v2574_v63  ;;  %v4587_v47 = vld [vmem:[#allocation2] sm:$0xff] }
 0x231   :  { %v2548_v59 = vadd.f32 %v2547_v19, %v2534_v51  ;;  %v2764_v19 = vperm.slane %v4889_v57, 4 }
 0x233   :  { %v2562_v3 = vadd.f32 %v2561_v22, %v2548_v59 }
 0x235   :  { %v2576_v9 = vadd.f32 %v2575_v24, %v2562_v3  ;;  %v4576_v6 = vpop.eup %4575 }
 0x246   :  { %v2587_v25 = vpop.f32.mrf.mxu2  ;;  %v2601_v16 = vpop.f32.mrf.mxu3 }
 0x247   :  { %v2615_v26 = vpop.f32.mrf.mxu0  ;;  %v2629_v21 = vpop.f32.mrf.mxu1  ;;  %v2588_v33 = vadd.f32 %v2587_v25, %v794_v30 }
 0x249   :  { %v2602_v39 = vadd.f32 %v2601_v16, %v2588_v33 }
 0x24b   :  { %v2616_v44 = vadd.f32 %v2615_v26, %v2602_v39  ;;  %v2775_v26 = vmul.f32 %v4576_v6, %v2763_v7 }
 0x24d   :  { %v2630_v53 = vadd.f32 %v2629_v21, %v2616_v44 }
 0x24e   :  { %v2589_v49 = vpop.f32.mrf.mxu2  ;;  %v2603_v28 = vpop.f32.mrf.mxu3 }
 0x24f   :  { %v2617_v29 = vpop.f32.mrf.mxu0  ;;  %v2631_v31 = vpop.f32.mrf.mxu1  ;;  %v2590_v46 = vadd.f32 %v2589_v49, %v794_v30  ;;  %v2765_v49 = vperm.slane %v4889_v57, 5 }
 0x251   :  { %v2604_v54 = vadd.f32 %v2603_v28, %v2590_v46  ;;  %v4752_v46 = vmov 2  }
 0x252   :  { %4561 = vset.pattern.permute.xlu2 %v4752_v46  ;;  %4562 = vset.pattern.permute.xlu0 %v4752_v46 }
 0x253   :  { %v2618_v0 = vadd.f32 %v2617_v29, %v2604_v54 }
 0x255   :  { %v2632_v60 = vadd.f32 %v2631_v31, %v2618_v0  ;;  %v2786_v31 = vadd.f32 %v4919_v12, %v2775_v26 }
 0x266   :  { %v2643_v34 = vpop.f32.mrf.mxu2  ;;  %v2657_v35 = vpop.f32.mrf.mxu3 }
 0x267   :  { %v2671_v37 = vpop.f32.mrf.mxu0  ;;  %v2685_v42 = vpop.f32.mrf.mxu1  ;;  %v2644_v56 = vadd.f32 %v2643_v34, %v2630_v53 }
 0x268   :  { %v2672_v58 = vadd.f32 %v2671_v37, %v795_v48 }
 0x269   :  { %v2658_v1 = vadd.f32 %v2657_v35, %v2644_v56 }
 0x26a   :  { %v2686_v2 = vadd.f32 %v2685_v42, %v2672_v58 }
 0x26b   :  { %4577 = vtanh.f32 %v2658_v1 }
 0x26c   :  { %4579 = vtanh.f32 %v2576_v9 }
 0x26e   :  { %v2645_v61 = vpop.f32.mrf.mxu2  ;;  %v2659_v50 = vpop.f32.mrf.mxu3 }
 0x26f   :  { %v2673_v45 = vpop.f32.mrf.mxu0  ;;  %v2687_v62 = vpop.f32.mrf.mxu1  ;;  %v2646_v23 = vadd.f32 %v2645_v61, %v2632_v60  ;;  %v4588_v61 = vld [vmem:[#allocation2 + $0x8] sm:$0xff] }
 0x270   :  { %v2674_v40 = vadd.f32 %v2673_v45, %v795_v48 }
 0x271   :  { %v2660_v14 = vadd.f32 %v2659_v50, %v2646_v23  ;;  %v4578_v22 = vpop.eup %4577 }
 0x272   :  { %v2688_v15 = vadd.f32 %v2687_v62, %v2674_v40  ;;  %v2776_v28 = vmul.f32 %v4578_v22, %v2764_v19  ;;  %v4580_v29 = vpop.eup %4579 }
 0x273   :  { %v2781_v38 = vmul.f32 %v4580_v29, %v2763_v7 }
 0x274   :  { %v2787_v35 = vadd.f32 %v2786_v31, %v2776_v28 }
 0x275   :  { %v2793_v27 = vadd.f32 %v4922_v41, %v2781_v38 }
 0x286   :  { %v2699_v4 = vpop.f32.mrf.mxu2  ;;  %v2713_v55 = vpop.f32.mrf.mxu3 }
 0x287   :  { %v2700_v5 = vadd.f32 %v2699_v4, %v2686_v2  ;;  %v2727_v11 = vpop.f32.mrf.mxu0  ;;  %v2741_v10 = vpop.f32.mrf.mxu1 }
 0x289   :  { %v2714_v8 = vadd.f32 %v2713_v55, %v2700_v5 }
 0x28b   :  { %v2728_v13 = vadd.f32 %v2727_v11, %v2714_v8 }
 0x28d   :  { %v2742_v17 = vadd.f32 %v2741_v10, %v2728_v13 }
 0x28e   :  { %v2701_v18 = vpop.f32.mrf.mxu2  ;;  %v2715_v16 = vpop.f32.mrf.mxu3 }
 0x28f   :  { %4581 = vtanh.f32 %v2742_v17  ;;  %v2702_v25 = vadd.f32 %v2701_v18, %v2688_v15  ;;  %v2729_v24 = vpop.f32.mrf.mxu0  ;;  %v2743_v30 = vpop.f32.mrf.mxu1 }
 0x290   :  { %4583 = vtanh.f32 %v2660_v14 }
 0x291   :  { %v2716_v21 = vadd.f32 %v2715_v16, %v2702_v25 }
 0x293   :  { %v2730_v20 = vadd.f32 %v2729_v24, %v2716_v21 }
 0x295   :  { %v4582_v32 = vpop.eup %4581  ;;  %v2744_v33 = vadd.f32 %v2743_v30, %v2730_v20 }
 0x296   :  { %v2777_v34 = vmul.f32 %v4582_v32, %v2765_v49  ;;  %v4584_v36 = vpop.eup %4583 }
 0x297   :  { %4585 = vtanh.f32 %v2744_v33  ;;  %v2782_v39 = vmul.f32 %v4584_v36, %v2764_v19 }
 0x298   :  { %v2788_v37 = vadd.f32 %v2787_v35, %v2777_v34 }
 0x299   :  { %v2794_v43 = vadd.f32 %v2793_v27, %v2782_v39 }
 0x29a   :  { %2789 = vadd.xlane.f32.xlu1 %v2788_v37 }
 0x29d   :  { %v4586_v42 = vpop.eup %4585 }
 0x29e   :  { %v2783_v57 = vmul.f32 %v4586_v42, %v2765_v49 }
 0x2a0   :  { %v2795_v44 = vadd.f32 %v2794_v43, %v2783_v57 }
 0x2a2   :  { %2796 = vadd.xlane.f32.xlu2 %v2795_v44 }
 0x30d   :  { %v2790_v12 = vpop.xlane.xlu1 %2789 }
 0x30e   :  { %v2798_v48 = vadd.f32 %v4587_v47, %v2790_v12 }
 0x310   :  { %2802 = vperm.xlu2 %4561, %v2798_v48  }
 0x315   :  { %v2797_v51 = vpop.xlane.xlu2 %2796 }
 0x316   :  { %v2799_v50 = vadd.f32 %v4588_v61, %v2797_v51 }
 0x318   :  { %2807 = vperm.xlu0 %4562, %v2799_v50  }
 0x36a   :  { %v2803_v52 = vpop.permute.xlu2 %2802 }
 0x36b   :  { %2810 = vst [vmem:[#allocation11] sm:$0xff] %v2803_v52 }
 0x38a   :  { %v2808_v41 = vpop.permute.xlu0 %2807 }
 0x38b   :  { %2811 = vst [vmem:[#allocation11 + $0x8] sm:$0xff] %v2808_v41 }
 0x38c   :  { %2824 = dma.vmem_to_hbm [thread:$0]  %s2817_s4, 256, %s2819_s21, [#allocation4], %s4746_s11, %s4746_s11, %s4747_s12  }
 0x38d   :  { %4739 = dma.done.wait [#allocation4], 256  }
 0x38e   :  { %4740 = vsyncadd [#allocation4], 4294967040 }
 0x38f   :  { %2829 = vsyncpa [#allocation3], 1 }
 0x390   :  { %2830 = vsyncpa [#allocation6], 1 }
 0x391   :  { %2831 = vsyncpa [#allocation9], 1 }
 0x392   :  { %2832 = vsyncpa [#allocation4], 1 }

</bundles_post_ra>
